<compile_context>
chip_gen: v5e
topology: v5e:2x2
jax: 0.10.0
libtpu: 0.0.40
codegen_flags: <defaults>
</compile_context>

<pallas_src>
import functools

import jax
import jax.numpy as jnp
from jax.experimental import pallas as pl
from jax.experimental.pallas import tpu as pltpu


def _round_up(n, m):
    return ((n + m - 1) // m) * m


@functools.lru_cache(maxsize=1)
def _device_vmem_bytes():
    """Physical VMEM per TensorCore; conservative fallback if query fails."""
    try:
        return int(pltpu.get_tpu_info().vmem_capacity_bytes)
    except Exception:
        return 64 << 20  # v7x-sized fallback, safe on every generation


def _resident_bytes(tm, d_model, d_ff, in_b, out_b):
    """VMEM needed when the full W1/W2 stay resident (default double-buffering)."""
    return (2 * tm * d_model * in_b          # x row tile
            + 2 * d_model * d_ff * in_b      # W1
            + 2 * d_ff * d_model * in_b      # W2
            + 2 * 8 * d_ff * in_b            # b1 (sublane-padded)
            + 2 * 8 * d_model * in_b         # b2
            + 2 * tm * d_model * out_b       # output row tile
            + tm * d_ff * 4)                 # f32 hidden activations


def _ktiled_bytes(tm, tkf, d_model, in_b, out_b):
    """VMEM needed for the d_ff-streaming (k-tiled) path."""
    return (2 * tm * d_model * in_b          # x row tile
            + 2 * d_model * tkf * in_b       # W1 k-slice
            + 2 * tkf * d_model * in_b       # W2 k-slice
            + 2 * 8 * tkf * in_b             # b1 k-slice
            + 2 * 8 * d_model * in_b         # b2
            + 2 * tm * d_model * out_b       # output row tile
            + tm * d_model * 4               # f32 accumulator scratch
            + tm * tkf * 4)                  # f32 hidden slice


def _select_tiles(n_rows, d_model, d_ff, in_b, out_b, budget, tm_req, kf_req):
    """Returns (tm, tkf, resident, vmem_need)."""
    row_cap = max(_round_up(min(n_rows, 1024), 128), 128)
    if tm_req is not None:
        tms = [min(max(128, _round_up(tm_req, 128)), row_cap)]
    else:
        tms = [t for t in (1024, 512, 256, 128) if t <= row_cap] or [128]

    # 1) Resident-weights fast path: weights DMA'd exactly once for the whole grid.
    if kf_req is None or kf_req >= d_ff:
        for t in tms:
            need = _resident_bytes(t, d_model, d_ff, in_b, out_b)
            if need <= budget:
                return t, d_ff, True, need

    # 2) Streaming path: tile d_ff along an "arbitrary" reduction grid axis.
    d_ff_p = _round_up(d_ff, 128)
    if kf_req is not None:
        kf = min(max(128, _round_up(kf_req, 128)), d_ff_p)
        kfs = [kf] if d_ff_p % kf == 0 else [128]
    else:
        kfs = [k for k in (2048, 1024, 512, 256, 128)
               if k <= d_ff_p and d_ff_p % k == 0] or [128]
    for t in tms:            # larger tm first: cuts weight re-streaming from HBM
        for kf in kfs:       # then larger tkf: cuts accumulator RMW / step overhead
            need = _ktiled_bytes(t, kf, d_model, in_b, out_b)
            if need <= budget:
                return t, kf, False, need
    return 128, 128, False, _ktiled_bytes(128, 128, d_model, in_b, out_b)


def _ffn_kernel_resident(x_ref, w1_ref, b1_ref, w2_ref, b2_ref, o_ref):
    # Full FFN for one row tile; W1/W2 stay resident in VMEM for the whole grid.
    h = jnp.dot(x_ref[...], w1_ref[...], preferred_element_type=jnp.float32)
    h = jnp.maximum(h + b1_ref[...].astype(jnp.float32), 0.0)
    y = jnp.dot(h.astype(w2_ref.dtype), w2_ref[...],
                preferred_element_type=jnp.float32)
    o_ref[...] = (y + b2_ref[...].astype(jnp.float32)).astype(o_ref.dtype)


def _ffn_kernel_ktiled(x_ref, w1_ref, b1_ref, w2_ref, b2_ref, o_ref, acc_ref, *,
                       nsteps):
    # One d_ff slice: h_k = relu(x @ W1[:, k] + b1[k]); acc += h_k @ W2[k, :].
    k = pl.program_id(1)
    h = jnp.dot(x_ref[...], w1_ref[...], preferred_element_type=jnp.float32)
    h = jnp.maximum(h + b1_ref[...].astype(jnp.float32), 0.0)
    part = jnp.dot(h.astype(w2_ref.dtype), w2_ref[...],
                   preferred_element_type=jnp.float32)

    if nsteps == 1:
        o_ref[...] = (part + b2_ref[...].astype(jnp.float32)).astype(o_ref.dtype)
        return

    @pl.when(k == 0)                       # first slice: direct write, no zero + RMW
    def _():
        acc_ref[...] = part

    @pl.when(jnp.logical_and(k > 0, k < nsteps - 1))
    def _():
        acc_ref[...] += part

    @pl.when(k == nsteps - 1)              # last slice: fold bias + cast into output
    def _():
        o_ref[...] = (acc_ref[...] + part
                      + b2_ref[...].astype(jnp.float32)).astype(o_ref.dtype)


@functools.partial(jax.jit, static_argnames=("tm", "kf_tile", "compute_dtype"))
def position_wise_ff(x, w1, b1, w2, b2, *, tm=None, kf_tile=None, compute_dtype=None):
    """Position-wise FFN.  x: (B, S, d_model); W1: (d_model, d_ff); W2: (d_ff, d_model).

    Weights are stored pre-transposed relative to nn.Linear (.weight.T).
    Returns a tensor with the same shape and dtype as x.
    """
    orig_dtype = x.dtype
    B, S, d_model = x.shape
    d_ff = w1.shape[1]
    assert w1.shape == (d_model, d_ff) and w2.shape == (d_ff, d_model)
    assert d_model % 128 == 0, "d_model must be a multiple of 128 (lane width)"

    if compute_dtype is not None:
        # NOTE: for best perf keep params stored in compute_dtype persistently so
        # this cast (a separate, un-hidden HBM pass) does not run on every call.
        x, w1, b1, w2, b2 = (t.astype(compute_dtype) for t in (x, w1, b1, w2, b2))

    b1 = b1.reshape(1, d_ff)
    b2 = b2.reshape(1, d_model)

    n_rows = B * S
    x2d = x.reshape(n_rows, d_model)

    in_b = jnp.dtype(x2d.dtype).itemsize
    out_b = jnp.dtype(orig_dtype).itemsize

    vmem_cap = _device_vmem_bytes()        # 64 MiB on v7x, 128 MiB on v5e/v6e
    budget = min(vmem_cap - (16 << 20), int(0.75 * vmem_cap))

    tm_sel, tkf, resident, need = _select_tiles(
        n_rows, d_model, d_ff, in_b, out_b, budget, tm, kf_tile)
    vmem_limit = int(min(max(int(1.5 * need) + (8 << 20), 32 << 20), vmem_cap))

    n_row_tiles = pl.cdiv(n_rows, tm_sel)
    flops = 4 * n_rows * d_model * d_ff
    weight_elems = 2 * d_model * d_ff + d_ff + d_model

    if resident:
        cost = pl.CostEstimate(
            flops=flops, transcendentals=0,
            bytes_accessed=int(in_b * (n_rows * d_model + weight_elems)
                               + out_b * n_rows * d_model))
        out2d = pl.pallas_call(
            _ffn_kernel_resident,
            out_shape=jax.ShapeDtypeStruct((n_rows, d_model), orig_dtype),
            grid_spec=pltpu.PrefetchScalarGridSpec(
                num_scalar_prefetch=0,
                grid=(n_row_tiles,),
                in_specs=[
                    pl.BlockSpec((tm_sel, d_model), lambda i: (i, 0)),  # x row tile
                    pl.BlockSpec((d_model, d_ff), lambda i: (0, 0)),    # W1 (resident)
                    pl.BlockSpec((1, d_ff), lambda i: (0, 0)),          # b1
                    pl.BlockSpec((d_ff, d_model), lambda i: (0, 0)),    # W2 (resident)
                    pl.BlockSpec((1, d_model), lambda i: (0, 0)),       # b2
                ],
                out_specs=pl.BlockSpec((tm_sel, d_model), lambda i: (i, 0)),
            ),
            compiler_params=pltpu.CompilerParams(
                dimension_semantics=("parallel",),
                vmem_limit_bytes=vmem_limit,
            ),
            cost_estimate=cost,
        )(x2d, w1, b1, w2, b2)
    else:
        d_ff_p = _round_up(d_ff, 128)
        if d_ff_p != d_ff:
            # Zero-pad d_ff: the extra W2 rows are zero, so the padded hidden
            # columns contribute nothing to the accumulator.
            pad = d_ff_p - d_ff
            w1 = jnp.pad(w1, ((0, 0), (0, pad)))
            b1 = jnp.pad(b1, ((0, 0), (0, pad)))
            w2 = jnp.pad(w2, ((0, pad), (0, 0)))
        nk = d_ff_p // tkf
        cost = pl.CostEstimate(
            flops=flops, transcendentals=0,
            bytes_accessed=int(
                in_b * (n_rows * d_model + int(n_row_tiles) * weight_elems)
                + out_b * n_rows * d_model))
        out2d = pl.pallas_call(
            functools.partial(_ffn_kernel_ktiled, nsteps=nk),
            out_shape=jax.ShapeDtypeStruct((n_rows, d_model), orig_dtype),
            grid_spec=pltpu.PrefetchScalarGridSpec(
                num_scalar_prefetch=0,
                grid=(n_row_tiles, nk),
                in_specs=[
                    pl.BlockSpec((tm_sel, d_model), lambda i, k: (i, 0)),  # x row tile
                    pl.BlockSpec((d_model, tkf), lambda i, k: (0, k)),     # W1 k-slice
                    pl.BlockSpec((1, tkf), lambda i, k: (0, k)),           # b1 k-slice
                    pl.BlockSpec((tkf, d_model), lambda i, k: (k, 0)),     # W2 k-slice
                    pl.BlockSpec((1, d_model), lambda i, k: (0, 0)),       # b2
                ],
                out_specs=pl.BlockSpec((tm_sel, d_model), lambda i, k: (i, 0)),
                scratch_shapes=[pltpu.VMEM((tm_sel, d_model), jnp.float32)],
            ),
            compiler_params=pltpu.CompilerParams(
                dimension_semantics=("parallel", "arbitrary"),
                vmem_limit_bytes=vmem_limit,
            ),
            cost_estimate=cost,
        )(x2d, w1, b1, w2, b2)

    return out2d.reshape(B, S, d_model)


def make_params(key, d_model, d_ff, dtype=jnp.float32):
    """Deterministic init mirroring nn.Linear shapes (weights stored pre-transposed)."""
    k1, k2, k3, k4 = jax.random.split(key, 4)
    bound1 = 1.0 / (d_model ** 0.5)
    bound2 = 1.0 / (d_ff ** 0.5)
    w1 = jax.random.uniform(k1, (d_model, d_ff), dtype, -bound1, bound1)   # fc1.weight.T
    b1 = jax.random.uniform(k2, (1, d_ff), dtype, -bound1, bound1)         # fc1.bias
    w2 = jax.random.uniform(k3, (d_ff, d_model), dtype, -bound2, bound2)   # fc2.weight.T
    b2 = jax.random.uniform(k4, (1, d_model), dtype, -bound2, bound2)      # fc2.bias
    return w1, b1, w2, b2


if __name__ == "__main__":
    d_model, d_ff = 256, 512     # values from the reference script
    batch, seq = 2, 8

    key = jax.random.PRNGKey(0)
    kx, kp = jax.random.split(key)
    x = jax.random.normal(kx, (batch, seq, d_model), jnp.float32)
    w1, b1, w2, b2 = make_params(kp, d_model, d_ff)

    # High-precision pure-JAX reference.
    hp = jax.lax.Precision.HIGHEST
    h_ref = jnp.maximum(
        jnp.einsum("bsd,df->bsf", x, w1, precision=hp) + b1[0], 0.0)
    ref = jnp.einsum("bsf,fd->bsd", h_ref, w2, precision=hp) + b2[0]

    # 1) Auto tiling (resident-weights path at this size), f32 operands.
    y = position_wise_ff(x, w1, b1, w2, b2)
    jax.block_until_ready(y)
    assert y.shape == x.shape and y.dtype == x.dtype
    err = float(jnp.max(jnp.abs(y - ref)))
    assert err < 1e-2, f"resident f32 path max abs err {err}"

    # 2) Force the streaming (d_ff-tiled) accumulator path.
    y_kt = position_wise_ff(x, w1, b1, w2, b2, tm=128, kf_tile=128)
    jax.block_until_ready(y_kt)
    err_kt = float(jnp.max(jnp.abs(y_kt - ref)))
    assert err_kt < 1e-2, f"k-tiled f32 path max abs err {err_kt}"

    # 3) bf16 operands / f32 accumulation (fast MXU path on v5e/v6e/v7x).
    y_bf = position_wise_ff(x, w1, b1, w2, b2, compute_dtype=jnp.bfloat16)
    jax.block_until_ready(y_bf)
    assert y_bf.shape == x.shape and y_bf.dtype == x.dtype
    err_bf = float(jnp.max(jnp.abs(y_bf - ref)))
    assert err_bf < 8e-2, f"bf16 path max abs err {err_bf}"

    print("KERNEL_OK")
</pallas_src>

<mosaic_0001>
module attributes {stable_mosaic.version = 11 : i64} {
  func.func @_ffn_kernel_resident(%arg0: i32, %arg1: memref<128x256xf32, #tpu.memory_space<vmem>>, %arg2: memref<256x512xf32, #tpu.memory_space<vmem>>, %arg3: memref<1x512xf32, #tpu.memory_space<vmem>>, %arg4: memref<512x256xf32, #tpu.memory_space<vmem>>, %arg5: memref<1x256xf32, #tpu.memory_space<vmem>>, %arg6: memref<128x256xf32, #tpu.memory_space<vmem>>) attributes {dimension_semantics = [#tpu.dimension_semantics<parallel>], iteration_bounds = array<i64: 1>, scalar_prefetch = 0 : i64, scratch_operands = 0 : i64, tpu.core_type = #tpu.core_type<tc>, window_params = [{transform_indices = @transform_0, window_bounds = array<i64: 128, 256>}, {pipeline_mode = #tpu.pipeline_mode<synchronous>, transform_indices = @transform_1, window_bounds = array<i64: 256, 512>}, {pipeline_mode = #tpu.pipeline_mode<synchronous>, transform_indices = @transform_2, window_bounds = array<i64: 1, 512>}, {pipeline_mode = #tpu.pipeline_mode<synchronous>, transform_indices = @transform_3, window_bounds = array<i64: 512, 256>}, {pipeline_mode = #tpu.pipeline_mode<synchronous>, transform_indices = @transform_4, window_bounds = array<i64: 1, 256>}, {transform_indices = @transform_5, window_bounds = array<i64: 128, 256>}]} {
    %c0 = arith.constant 0 : index
    %c0_0 = arith.constant 0 : index
    %0 = vector.load %arg1[%c0, %c0_0] : memref<128x256xf32, #tpu.memory_space<vmem>>, vector<128x256xf32>
    %c0_1 = arith.constant 0 : index
    %c0_2 = arith.constant 0 : index
    %1 = vector.load %arg2[%c0_1, %c0_2] : memref<256x512xf32, #tpu.memory_space<vmem>>, vector<256x512xf32>
    %cst = arith.constant dense<0.000000e+00> : vector<128x512xf32>
    %2 = tpu.matmul %0, %1, %cst {dimension_numbers = #tpu.dot_dimension_numbers<[1], [0], [0], [1], [0, 0, 1, 1], [], []>} : vector<128x256xf32>, vector<256x512xf32>, vector<128x512xf32> -> vector<128x512xf32>
    %c0_3 = arith.constant 0 : index
    %c0_4 = arith.constant 0 : index
    %3 = vector.load %arg3[%c0_3, %c0_4] : memref<1x512xf32, #tpu.memory_space<vmem>>, vector<1x512xf32>
    %4 = vector.broadcast %3 : vector<1x512xf32> to vector<128x512xf32>
    %5 = arith.addf %2, %4 : vector<128x512xf32>
    %cst_5 = arith.constant 0.000000e+00 : f32
    %6 = vector.broadcast %cst_5 : f32 to vector<128x512xf32>
    %7 = arith.maximumf %5, %6 : vector<128x512xf32>
    %c0_6 = arith.constant 0 : index
    %c0_7 = arith.constant 0 : index
    %8 = vector.load %arg4[%c0_6, %c0_7] : memref<512x256xf32, #tpu.memory_space<vmem>>, vector<512x256xf32>
    %cst_8 = arith.constant dense<0.000000e+00> : vector<128x256xf32>
    %9 = tpu.matmul %7, %8, %cst_8 {dimension_numbers = #tpu.dot_dimension_numbers<[1], [0], [0], [1], [0, 0, 1, 1], [], []>} : vector<128x512xf32>, vector<512x256xf32>, vector<128x256xf32> -> vector<128x256xf32>
    %c0_9 = arith.constant 0 : index
    %c0_10 = arith.constant 0 : index
    %10 = vector.load %arg5[%c0_9, %c0_10] : memref<1x256xf32, #tpu.memory_space<vmem>>, vector<1x256xf32>
    %11 = vector.broadcast %10 : vector<1x256xf32> to vector<128x256xf32>
    %12 = arith.addf %9, %11 : vector<128x256xf32>
    %c0_11 = arith.constant 0 : index
    %c0_12 = arith.constant 0 : index
    %13 = vector.load %arg6[%c0_11, %c0_12] : memref<128x256xf32, #tpu.memory_space<vmem>>, vector<128x256xf32>
    tpu.vector_store %arg6[%c0_11, %c0_12], %12 {strides = array<i32>} : memref<128x256xf32, #tpu.memory_space<vmem>>, vector<128x256xf32>,
    return
  }
  func.func @transform_0(%arg0: i32) -> (i32, i32) {
    %c0_i32 = arith.constant 0 : i32
    %c0_i32_0 = arith.constant 0 : i32
    return %arg0, %c0_i32 : i32, i32
  }
  func.func @transform_1(%arg0: i32) -> (i32, i32) {
    %c0_i32 = arith.constant 0 : i32
    %c0_i32_0 = arith.constant 0 : i32
    %c0_i32_1 = arith.constant 0 : i32
    return %c0_i32, %c0_i32_0 : i32, i32
  }
  func.func @transform_2(%arg0: i32) -> (i32, i32) {
    %c0_i32 = arith.constant 0 : i32
    %c0_i32_0 = arith.constant 0 : i32
    %c0_i32_1 = arith.constant 0 : i32
    return %c0_i32, %c0_i32_0 : i32, i32
  }
  func.func @transform_3(%arg0: i32) -> (i32, i32) {
    %c0_i32 = arith.constant 0 : i32
    %c0_i32_0 = arith.constant 0 : i32
    %c0_i32_1 = arith.constant 0 : i32
    return %c0_i32, %c0_i32_0 : i32, i32
  }
  func.func @transform_4(%arg0: i32) -> (i32, i32) {
    %c0_i32 = arith.constant 0 : i32
    %c0_i32_0 = arith.constant 0 : i32
    %c0_i32_1 = arith.constant 0 : i32
    return %c0_i32, %c0_i32_0 : i32, i32
  }
  func.func @transform_5(%arg0: i32) -> (i32, i32) {
    %c0_i32 = arith.constant 0 : i32
    %c0_i32_0 = arith.constant 0 : i32
    return %arg0, %c0_i32 : i32, i32
  }
}

</mosaic_0001>

<bundles_post_ra>
// kernel: position_wise_ff.1
= control target key start
LH: loop header
LB: loop body
LE: loop exit
PB: predicated region body
PF: predicated region fallthrough
CT: control target
= control target key end

     0   :  { %10 = vsyncpa [#allocation3], 0  ;;  %s2648_s0 = inlined_call_operand.hbm [shape: f32[16,256], index: 0, kind: input, shape index: {}]   ;;  %s2649_s1 = inlined_call_operand.hbm [shape: f32[256,512], index: 1, kind: input, shape index: {}]   ;;  %s2650_s2 = inlined_call_operand.hbm [shape: f32[1,512], index: 2, kind: input, shape index: {}]   ;;  %s2651_s3 = inlined_call_operand.hbm [shape: f32[512,256], index: 3, kind: input, shape index: {}]   ;;  %s2652_s4 = inlined_call_operand.vmem [shape: f32[1,256], index: 4, kind: input, shape index: {}]   ;;  %s2653_s5 = inlined_call_operand.hbm [shape: f32[16,256], index: 5, kind: output, shape index: {}]  }
   0x1   :  { %11 = vsyncpa [#allocation6], 0 }
   0x2   :  { %12 = vsyncpa [#allocation9], 0 }
   0x3   :  { %13 = vsyncpa [#allocation4], 0  ;;  %s31_s20 = sshll.u32 %s2649_s1, 4  ;;  %s32_s20 = int_to_ptr.hbm [resolvable:$true] %s31_s20 }
   0x4   :  { %17 = vsyncadd [#allocation3], 3584  ;;  %s1680_s21 = smov [#allocation5]   ;;  %s18_s25 = sshll.u32 %s2648_s0, 4  ;;  %s19_s25 = int_to_ptr.hbm [resolvable:$true] %s18_s25 }
   0x5   :  { %s33_s22 = sshll.u32 %s1680_s21, 4  ;;  %s1681_s26 = smov 512   ;;  %s34_s22 = int_to_ptr.vmem [resolvable:$true] %s33_s22 }
   0x6   :  { %s1682_s27 = smov 32   ;;  %s1683_s28 = smov [#allocation2]  }
   0x7   :  { %39 = dma.hbm_to_vmem [thread:$0]  %s32_s20, 16384, %s34_s22, [#allocation6], %s1681_s26, %s1681_s26, %s1682_s27  }
   0x8   :  { %s20_s29 = sshll.u32 %s1683_s28, 4  ;;  %s1684_s30 = smov 256   ;;  %s21_s29 = int_to_ptr.vmem [resolvable:$true] %s20_s29 }
   0x9   :  { %s1685_s6 = smov 16   ;;  %s45_s8 = sshll.u32 %s2650_s2, 4  ;;  %s46_s8 = int_to_ptr.hbm [resolvable:$true] %s45_s8 }
   0xa   :  { %26 = dma.hbm_to_vmem [thread:$0]  %s19_s25, 512, %s21_s29, [#allocation3], %s1684_s30, %s1684_s30, %s1685_s6  }
   0xb   :  { %s1686_s9 = smov [#allocation7]   ;;  %s55_s12 = sshll.u32 %s2651_s3, 4  ;;  %s56_s12 = int_to_ptr.hbm [resolvable:$true] %s55_s12 }
   0xc   :  { %s47_s0 = sshll.u32 %s1686_s9, 4  ;;  %s1687_s13 = smov [#allocation8]   ;;  %s48_s0 = int_to_ptr.vmem [resolvable:$true] %s47_s0 }
   0xd   :  { %50 = dma.hbm_to_vmem [thread:$0]  %s46_s8, 64, %s48_s0, [#allocation6]  }
   0xe   :  { %s57_s14 = sshll.u32 %s1687_s13, 4  ;;  %s58_s14 = int_to_ptr.vmem [resolvable:$true] %s57_s14 }
   0xf   :  { %63 = dma.hbm_to_vmem [thread:$0]  %s56_s12, 16384, %s58_s14, [#allocation9], %s1684_s30, %s1684_s30, %s1685_s6  }
  0x10   :  { %1672 = dma.done.wait [#allocation3], 4096  }
  0x11   :  { %1673 = vsyncadd [#allocation3], 4294963200 }
  0x12   :  { %1674 = dma.done.wait [#allocation6], 16448  }
  0x13   :  { %1675 = vsyncadd [#allocation6], 4294950848 }
  0x14   :  { %1676 = dma.done.wait [#allocation9], 16384  }
  0x15   :  { %1677 = vsyncadd [#allocation9], 4294950912  ;;  %v174_v0 = vld [vmem:[#allocation5 + $0x1e0] sm:$0xff]  ;;  %v175_v2 = vld [vmem:[#allocation5 + $0x1e8] sm:$0xff] }
  0x16   :  { %v238_v1 = vld [vmem:[#allocation5 + $0x3e0] sm:$0xff]  ;;  %252 = vmatpush.msra.mxu0 %v174_v0  ;;  %v171_v5 = vld [vmem:[#allocation5 + $0x1c8] sm:$0xff]  ;;  %382 = vmatpush.msra.mxu2 %v175_v2  ;;  %v177_v2 = vld [vmem:[#allocation5 + $0x1f8] sm:$0xff] }
  0x17   :  { %317 = vmatpush.msra.mxu1 %v238_v1  ;;  %v170_v3 = vld [vmem:[#allocation5 + $0x1c0] sm:$0xff]  ;;  %v239_v6 = vld [vmem:[#allocation5 + $0x3e8] sm:$0xff] }
  0x18   :  { %v234_v4 = vld [vmem:[#allocation5 + $0x3c0] sm:$0xff]  ;;  %253 = vmatpush.msra.mxu0 %v170_v3  ;;  %v167_v9 = vld [vmem:[#allocation5 + $0x1a8] sm:$0xff]  ;;  %383 = vmatpush.msra.mxu2 %v171_v5  ;;  %v241_v3 = vld [vmem:[#allocation5 + $0x3f8] sm:$0xff] }
  0x19   :  { %v166_v7 = vld [vmem:[#allocation5 + $0x1a0] sm:$0xff]  ;;  %318 = vmatpush.msra.mxu1 %v234_v4  ;;  %v235_v10 = vld [vmem:[#allocation5 + $0x3c8] sm:$0xff]  ;;  %447 = vmatpush.msra.mxu3 %v239_v6  ;;  %v176_v4 = vld [vmem:[#allocation5 + $0x1f0] sm:$0xff] }
  0x1a   :  { %v230_v8 = vld [vmem:[#allocation5 + $0x3a0] sm:$0xff]  ;;  %254 = vmatpush.msra.mxu0 %v166_v7  ;;  %v163_v13 = vld [vmem:[#allocation5 + $0x188] sm:$0xff]  ;;  %384 = vmatpush.msra.mxu2 %v167_v9  ;;  %v240_v5 = vld [vmem:[#allocation5 + $0x3f0] sm:$0xff] }
  0x1b   :  { %v162_v11 = vld [vmem:[#allocation5 + $0x180] sm:$0xff]  ;;  %319 = vmatpush.msra.mxu1 %v230_v8  ;;  %v231_v14 = vld [vmem:[#allocation5 + $0x3a8] sm:$0xff]  ;;  %448 = vmatpush.msra.mxu3 %v235_v10  ;;  %v173_v6 = vld [vmem:[#allocation5 + $0x1d8] sm:$0xff] }
  0x1c   :  { %v226_v12 = vld [vmem:[#allocation5 + $0x380] sm:$0xff]  ;;  %255 = vmatpush.msra.mxu0 %v162_v11  ;;  %v159_v17 = vld [vmem:[#allocation5 + $0x168] sm:$0xff]  ;;  %385 = vmatpush.msra.mxu2 %v163_v13  ;;  %v237_v7 = vld [vmem:[#allocation5 + $0x3d8] sm:$0xff] }
  0x1d   :  { %v158_v15 = vld [vmem:[#allocation5 + $0x160] sm:$0xff]  ;;  %320 = vmatpush.msra.mxu1 %v226_v12  ;;  %v227_v18 = vld [vmem:[#allocation5 + $0x388] sm:$0xff]  ;;  %449 = vmatpush.msra.mxu3 %v231_v14  ;;  %v172_v8 = vld [vmem:[#allocation5 + $0x1d0] sm:$0xff] }
  0x1e   :  { %v222_v16 = vld [vmem:[#allocation5 + $0x360] sm:$0xff]  ;;  %256 = vmatpush.msra.mxu0 %v158_v15  ;;  %v155_v21 = vld [vmem:[#allocation5 + $0x148] sm:$0xff]  ;;  %386 = vmatpush.msra.mxu2 %v159_v17  ;;  %v236_v9 = vld [vmem:[#allocation5 + $0x3d0] sm:$0xff] }
  0x1f   :  { %v154_v19 = vld [vmem:[#allocation5 + $0x140] sm:$0xff]  ;;  %321 = vmatpush.msra.mxu1 %v222_v16  ;;  %v223_v22 = vld [vmem:[#allocation5 + $0x368] sm:$0xff]  ;;  %450 = vmatpush.msra.mxu3 %v227_v18  ;;  %v169_v10 = vld [vmem:[#allocation5 + $0x1b8] sm:$0xff] }
  0x20   :  { %v218_v20 = vld [vmem:[#allocation5 + $0x340] sm:$0xff]  ;;  %257 = vmatpush.msra.mxu0 %v154_v19  ;;  %v151_v25 = vld [vmem:[#allocation5 + $0x128] sm:$0xff]  ;;  %387 = vmatpush.msra.mxu2 %v155_v21  ;;  %v233_v11 = vld [vmem:[#allocation5 + $0x3b8] sm:$0xff] }
  0x21   :  { %v150_v23 = vld [vmem:[#allocation5 + $0x120] sm:$0xff]  ;;  %322 = vmatpush.msra.mxu1 %v218_v20  ;;  %v219_v26 = vld [vmem:[#allocation5 + $0x348] sm:$0xff]  ;;  %451 = vmatpush.msra.mxu3 %v223_v22  ;;  %v168_v12 = vld [vmem:[#allocation5 + $0x1b0] sm:$0xff] }
  0x22   :  { %v214_v24 = vld [vmem:[#allocation5 + $0x320] sm:$0xff]  ;;  %258 = vmatpush.msra.mxu0 %v150_v23  ;;  %v147_v29 = vld [vmem:[#allocation5 + $0x108] sm:$0xff]  ;;  %388 = vmatpush.msra.mxu2 %v151_v25  ;;  %v1745_v13 = vld [vmem:[#allocation2 + $0x10] sm:$0xff] }
  0x23   :  { %v146_v27 = vld [vmem:[#allocation5 + $0x100] sm:$0xff]  ;;  %323 = vmatpush.msra.mxu1 %v214_v24  ;;  %v215_v30 = vld [vmem:[#allocation5 + $0x328] sm:$0xff]  ;;  %452 = vmatpush.msra.mxu3 %v219_v26  ;;  %v1747_v14 = vld [vmem:[#allocation2 + $0x18] sm:$0xff] }
  0x24   :  { %v210_v28 = vld [vmem:[#allocation5 + $0x300] sm:$0xff]  ;;  %259 = vmatpush.msra.mxu0 %v146_v27  ;;  %v143_v33 = vld [vmem:[#allocation5 + $0xe8] sm:$0xff]  ;;  %389 = vmatpush.msra.mxu2 %v147_v29  ;;  %v232_v15 = vld [vmem:[#allocation5 + $0x3b0] sm:$0xff] }
  0x25   :  { %v142_v31 = vld [vmem:[#allocation5 + $0xe0] sm:$0xff]  ;;  %324 = vmatpush.msra.mxu1 %v210_v28  ;;  %v211_v34 = vld [vmem:[#allocation5 + $0x308] sm:$0xff]  ;;  %453 = vmatpush.msra.mxu3 %v215_v30  ;;  %v165_v16 = vld [vmem:[#allocation5 + $0x198] sm:$0xff] }
  0x26   :  { %v206_v32 = vld [vmem:[#allocation5 + $0x2e0] sm:$0xff]  ;;  %260 = vmatpush.msra.mxu0 %v142_v31  ;;  %v139_v37 = vld [vmem:[#allocation5 + $0xc8] sm:$0xff]  ;;  %390 = vmatpush.msra.mxu2 %v143_v33  ;;  %v229_v17 = vld [vmem:[#allocation5 + $0x398] sm:$0xff] }
  0x27   :  { %v138_v35 = vld [vmem:[#allocation5 + $0xc0] sm:$0xff]  ;;  %325 = vmatpush.msra.mxu1 %v206_v32  ;;  %v207_v38 = vld [vmem:[#allocation5 + $0x2e8] sm:$0xff]  ;;  %454 = vmatpush.msra.mxu3 %v211_v34  ;;  %v164_v18 = vld [vmem:[#allocation5 + $0x190] sm:$0xff] }
  0x28   :  { %v202_v36 = vld [vmem:[#allocation5 + $0x2c0] sm:$0xff]  ;;  %261 = vmatpush.msra.mxu0 %v138_v35  ;;  %v135_v41 = vld [vmem:[#allocation5 + $0xa8] sm:$0xff]  ;;  %391 = vmatpush.msra.mxu2 %v139_v37  ;;  %v228_v19 = vld [vmem:[#allocation5 + $0x390] sm:$0xff] }
  0x29   :  { %v134_v39 = vld [vmem:[#allocation5 + $0xa0] sm:$0xff]  ;;  %326 = vmatpush.msra.mxu1 %v202_v36  ;;  %v203_v42 = vld [vmem:[#allocation5 + $0x2c8] sm:$0xff]  ;;  %455 = vmatpush.msra.mxu3 %v207_v38  ;;  %v161_v20 = vld [vmem:[#allocation5 + $0x178] sm:$0xff] }
  0x2a   :  { %v198_v40 = vld [vmem:[#allocation5 + $0x2a0] sm:$0xff]  ;;  %262 = vmatpush.msra.mxu0 %v134_v39  ;;  %v131_v45 = vld [vmem:[#allocation5 + $0x88] sm:$0xff]  ;;  %392 = vmatpush.msra.mxu2 %v135_v41  ;;  %v225_v21 = vld [vmem:[#allocation5 + $0x378] sm:$0xff] }
  0x2b   :  { %v130_v43 = vld [vmem:[#allocation5 + $0x80] sm:$0xff]  ;;  %327 = vmatpush.msra.mxu1 %v198_v40  ;;  %v199_v46 = vld [vmem:[#allocation5 + $0x2a8] sm:$0xff]  ;;  %456 = vmatpush.msra.mxu3 %v203_v42  ;;  %v160_v22 = vld [vmem:[#allocation5 + $0x170] sm:$0xff] }
  0x2c   :  { %v194_v44 = vld [vmem:[#allocation5 + $0x280] sm:$0xff]  ;;  %263 = vmatpush.msra.mxu0 %v130_v43  ;;  %v127_v49 = vld [vmem:[#allocation5 + $0x68] sm:$0xff]  ;;  %393 = vmatpush.msra.mxu2 %v131_v45  ;;  %v224_v23 = vld [vmem:[#allocation5 + $0x370] sm:$0xff] }
  0x2d   :  { %v126_v47 = vld [vmem:[#allocation5 + $0x60] sm:$0xff]  ;;  %328 = vmatpush.msra.mxu1 %v194_v44  ;;  %v195_v50 = vld [vmem:[#allocation5 + $0x288] sm:$0xff]  ;;  %457 = vmatpush.msra.mxu3 %v199_v46  ;;  %v157_v24 = vld [vmem:[#allocation5 + $0x158] sm:$0xff] }
  0x2e   :  { %v190_v48 = vld [vmem:[#allocation5 + $0x260] sm:$0xff]  ;;  %264 = vmatpush.msra.mxu0 %v126_v47  ;;  %v123_v53 = vld [vmem:[#allocation5 + $0x48] sm:$0xff]  ;;  %394 = vmatpush.msra.mxu2 %v127_v49  ;;  %v221_v25 = vld [vmem:[#allocation5 + $0x358] sm:$0xff] }
  0x2f   :  { %v122_v51 = vld [vmem:[#allocation5 + $0x40] sm:$0xff]  ;;  %329 = vmatpush.msra.mxu1 %v190_v48  ;;  %v191_v54 = vld [vmem:[#allocation5 + $0x268] sm:$0xff]  ;;  %458 = vmatpush.msra.mxu3 %v195_v50  ;;  %v156_v26 = vld [vmem:[#allocation5 + $0x150] sm:$0xff] }
  0x30   :  { %v186_v52 = vld [vmem:[#allocation5 + $0x240] sm:$0xff]  ;;  %265 = vmatpush.msra.mxu0 %v122_v51  ;;  %v119_v57 = vld [vmem:[#allocation5 + $0x28] sm:$0xff]  ;;  %395 = vmatpush.msra.mxu2 %v123_v53  ;;  %v220_v29 = vld [vmem:[#allocation5 + $0x350] sm:$0xff] }
  0x31   :  { %v118_v55 = vld [vmem:[#allocation5 + $0x20] sm:$0xff]  ;;  %330 = vmatpush.msra.mxu1 %v186_v52  ;;  %v187_v58 = vld [vmem:[#allocation5 + $0x248] sm:$0xff]  ;;  %459 = vmatpush.msra.mxu3 %v191_v54  ;;  %v153_v30 = vld [vmem:[#allocation5 + $0x138] sm:$0xff] }
  0x32   :  { %v182_v56 = vld [vmem:[#allocation5 + $0x220] sm:$0xff]  ;;  %266 = vmatpush.msra.mxu0 %v118_v55  ;;  %v115_v61 = vld [vmem:[#allocation5 + $0x8] sm:$0xff]  ;;  %396 = vmatpush.msra.mxu2 %v119_v57  ;;  %v217_v31 = vld [vmem:[#allocation5 + $0x338] sm:$0xff] }
  0x33   :  { %v114_v59 = vld [vmem:[#allocation5] sm:$0xff]  ;;  %331 = vmatpush.msra.mxu1 %v182_v56  ;;  %v183_v62 = vld [vmem:[#allocation5 + $0x228] sm:$0xff]  ;;  %460 = vmatpush.msra.mxu3 %v187_v58  ;;  %v152_v32 = vld [vmem:[#allocation5 + $0x130] sm:$0xff] }
  0x34   :  { %v178_v60 = vld [vmem:[#allocation5 + $0x200] sm:$0xff]  ;;  %v1739_v0 = vld [vmem:[#allocation2 + $0x8] sm:$0xff]  ;;  %267 = vmatpush.msra.mxu0 %v114_v59  ;;  %397 = vmatpush.msra.mxu2 %v115_v61  ;;  %v216_v33 = vld [vmem:[#allocation5 + $0x330] sm:$0xff] }
  0x35   :  { %v1737_v63 = vld [vmem:[#allocation2] sm:$0xff]  ;;  %332 = vmatpush.msra.mxu1 %v178_v60  ;;  %v179_v1 = vld [vmem:[#allocation5 + $0x208] sm:$0xff]  ;;  %461 = vmatpush.msra.mxu3 %v183_v62  ;;  %v1761_v34 = vld [vmem:[#allocation2 + $0x30] sm:$0xff] }
  0x36   :  { %268 = vmatmul.f32.vlgmr.msra.gmra.mxu0 %v1737_v63  ;;  %333 = vmatmul.f32.vlgmr.msra.gmra.mxu1 %v1739_v0  ;;  %v1753_v27 = vld [vmem:[#allocation2 + $0x20] sm:$0xff]  ;;  %v1755_v28 = vld [vmem:[#allocation2 + $0x28] sm:$0xff]  ;;  %v1763_v35 = vld [vmem:[#allocation2 + $0x38] sm:$0xff] }
  0x37   :  { %398 = vmatmul.f32.vlgmr.msra.gmra.mxu2 %v1737_v63  ;;  %462 = vmatpush.msra.mxu3 %v179_v1  ;;  %v149_v36 = vld [vmem:[#allocation5 + $0x118] sm:$0xff]  ;;  %v148_v38 = vld [vmem:[#allocation5 + $0x110] sm:$0xff]  ;;  %v1769_v40 = vld [vmem:[#allocation2 + $0x40] sm:$0xff] }
  0x38   :  { %642 = vmatpush.msrb.mxu2 %v177_v2  ;;  %463 = vmatmul.f32.vlgmr.msra.gmra.mxu3 %v1739_v0  ;;  %v213_v37 = vld [vmem:[#allocation5 + $0x318] sm:$0xff]  ;;  %v212_v39 = vld [vmem:[#allocation5 + $0x310] sm:$0xff]  ;;  %v1771_v41 = vld [vmem:[#allocation2 + $0x48] sm:$0xff] }
  0x39   :  { %707 = vmatpush.msrb.mxu3 %v241_v3  ;;  %512 = vmatpush.msrb.mxu0 %v176_v4  ;;  %v145_v42 = vld [vmem:[#allocation5 + $0xf8] sm:$0xff]  ;;  %v144_v44 = vld [vmem:[#allocation5 + $0xf0] sm:$0xff]  ;;  %v1785_v52 = vld [vmem:[#allocation2 + $0x60] sm:$0xff] }
  0x3a   :  { %577 = vmatpush.msrb.mxu1 %v240_v5  ;;  %643 = vmatpush.msrb.mxu2 %v173_v6  ;;  %v209_v43 = vld [vmem:[#allocation5 + $0x2f8] sm:$0xff]  ;;  %v208_v45 = vld [vmem:[#allocation5 + $0x2f0] sm:$0xff]  ;;  %v1787_v53 = vld [vmem:[#allocation2 + $0x68] sm:$0xff] }
  0x3b   :  { %708 = vmatpush.msrb.mxu3 %v237_v7  ;;  %513 = vmatpush.msrb.mxu0 %v172_v8  ;;  %v1777_v46 = vld [vmem:[#allocation2 + $0x50] sm:$0xff]  ;;  %v1779_v47 = vld [vmem:[#allocation2 + $0x58] sm:$0xff]  ;;  %v1801_v2 = vld [vmem:[#allocation2 + $0x80] sm:$0xff] }
  0x3c   :  { %578 = vmatpush.msrb.mxu1 %v236_v9  ;;  %644 = vmatpush.msrb.mxu2 %v169_v10  ;;  %v141_v48 = vld [vmem:[#allocation5 + $0xd8] sm:$0xff]  ;;  %v140_v50 = vld [vmem:[#allocation5 + $0xd0] sm:$0xff]  ;;  %v1803_v3 = vld [vmem:[#allocation2 + $0x88] sm:$0xff] }
  0x3d   :  { %709 = vmatpush.msrb.mxu3 %v233_v11  ;;  %514 = vmatpush.msrb.mxu0 %v168_v12  ;;  %v205_v49 = vld [vmem:[#allocation5 + $0x2d8] sm:$0xff]  ;;  %v204_v51 = vld [vmem:[#allocation5 + $0x2d0] sm:$0xff] }
  0x3e   :  { %271 = vmatmul.f32.gmra.mxu0 %v1745_v13  ;;  %336 = vmatmul.f32.gmra.mxu1 %v1747_v14  ;;  %v137_v54 = vld [vmem:[#allocation5 + $0xb8] sm:$0xff]  ;;  %v136_v56 = vld [vmem:[#allocation5 + $0xb0] sm:$0xff] }
  0x3f   :  { %401 = vmatmul.f32.gmra.mxu2 %v1745_v13  ;;  %579 = vmatpush.msrb.mxu1 %v232_v15  ;;  %v201_v55 = vld [vmem:[#allocation5 + $0x2b8] sm:$0xff]  ;;  %v200_v57 = vld [vmem:[#allocation5 + $0x2b0] sm:$0xff] }
  0x40   :  { %466 = vmatmul.f32.gmra.mxu3 %v1747_v14  ;;  %645 = vmatpush.msrb.mxu2 %v165_v16  ;;  %v1793_v58 = vld [vmem:[#allocation2 + $0x70] sm:$0xff]  ;;  %v1795_v59 = vld [vmem:[#allocation2 + $0x78] sm:$0xff]  ;;  %v1817_v16 = vld [vmem:[#allocation2 + $0xa0] sm:$0xff] }
  0x41   :  { %710 = vmatpush.msrb.mxu3 %v229_v17  ;;  %515 = vmatpush.msrb.mxu0 %v164_v18  ;;  %v133_v60 = vld [vmem:[#allocation5 + $0x98] sm:$0xff]  ;;  %v132_v62 = vld [vmem:[#allocation5 + $0x90] sm:$0xff]  ;;  %v1819_v17 = vld [vmem:[#allocation2 + $0xa8] sm:$0xff] }
  0x42   :  { %580 = vmatpush.msrb.mxu1 %v228_v19  ;;  %646 = vmatpush.msrb.mxu2 %v161_v20  ;;  %v197_v61 = vld [vmem:[#allocation5 + $0x298] sm:$0xff]  ;;  %v196_v1 = vld [vmem:[#allocation5 + $0x290] sm:$0xff] }
  0x43   :  { %711 = vmatpush.msrb.mxu3 %v225_v21  ;;  %516 = vmatpush.msrb.mxu0 %v160_v22  ;;  %v129_v4 = vld [vmem:[#allocation5 + $0x78] sm:$0xff]  ;;  %v128_v6 = vld [vmem:[#allocation5 + $0x70] sm:$0xff] }
  0x44   :  { %581 = vmatpush.msrb.mxu1 %v224_v23  ;;  %647 = vmatpush.msrb.mxu2 %v157_v24  ;;  %v193_v5 = vld [vmem:[#allocation5 + $0x278] sm:$0xff]  ;;  %v192_v7 = vld [vmem:[#allocation5 + $0x270] sm:$0xff] }
  0x45   :  { %712 = vmatpush.msrb.mxu3 %v221_v25  ;;  %517 = vmatpush.msrb.mxu0 %v156_v26  ;;  %v1809_v8 = vld [vmem:[#allocation2 + $0x90] sm:$0xff]  ;;  %v1811_v9 = vld [vmem:[#allocation2 + $0x98] sm:$0xff] }
  0x46   :  { %274 = vmatmul.f32.gmra.mxu0 %v1753_v27  ;;  %339 = vmatmul.f32.gmra.mxu1 %v1755_v28  ;;  %v125_v10 = vld [vmem:[#allocation5 + $0x58] sm:$0xff]  ;;  %v124_v12 = vld [vmem:[#allocation5 + $0x50] sm:$0xff] }
  0x47   :  { %404 = vmatmul.f32.gmra.mxu2 %v1753_v27  ;;  %582 = vmatpush.msrb.mxu1 %v220_v29  ;;  %v189_v11 = vld [vmem:[#allocation5 + $0x258] sm:$0xff]  ;;  %v188_v15 = vld [vmem:[#allocation5 + $0x250] sm:$0xff]  ;;  %v1833_v29 = vld [vmem:[#allocation2 + $0xc0] sm:$0xff] }
  0x48   :  { %469 = vmatmul.f32.gmra.mxu3 %v1755_v28  ;;  %648 = vmatpush.msrb.mxu2 %v153_v30  ;;  %v121_v18 = vld [vmem:[#allocation5 + $0x38] sm:$0xff]  ;;  %v120_v20 = vld [vmem:[#allocation5 + $0x30] sm:$0xff]  ;;  %v1835_v30 = vld [vmem:[#allocation2 + $0xc8] sm:$0xff] }
  0x49   :  { %713 = vmatpush.msrb.mxu3 %v217_v31  ;;  %518 = vmatpush.msrb.mxu0 %v152_v32  ;;  %v185_v19 = vld [vmem:[#allocation5 + $0x238] sm:$0xff]  ;;  %v184_v21 = vld [vmem:[#allocation5 + $0x230] sm:$0xff] }
  0x4a   :  { %583 = vmatpush.msrb.mxu1 %v216_v33  ;;  %649 = vmatpush.msrb.mxu2 %v149_v36  ;;  %v1825_v22 = vld [vmem:[#allocation2 + $0xb0] sm:$0xff]  ;;  %v1827_v23 = vld [vmem:[#allocation2 + $0xb8] sm:$0xff] }
  0x4b   :  { %714 = vmatpush.msrb.mxu3 %v213_v37  ;;  %519 = vmatpush.msrb.mxu0 %v148_v38  ;;  %v117_v24 = vld [vmem:[#allocation5 + $0x18] sm:$0xff]  ;;  %v116_v26 = vld [vmem:[#allocation5 + $0x10] sm:$0xff] }
  0x4c   :  { %584 = vmatpush.msrb.mxu1 %v212_v39  ;;  %650 = vmatpush.msrb.mxu2 %v145_v42  ;;  %v181_v25 = vld [vmem:[#allocation5 + $0x218] sm:$0xff]  ;;  %v180_v31 = vld [vmem:[#allocation5 + $0x210] sm:$0xff]  ;;  %v1849_v39 = vld [vmem:[#allocation2 + $0xe0] sm:$0xff] }
  0x4d   :  { %715 = vmatpush.msrb.mxu3 %v209_v43  ;;  %520 = vmatpush.msrb.mxu0 %v144_v44  ;;  %v1841_v32 = vld [vmem:[#allocation2 + $0xd0] sm:$0xff]  ;;  %v1843_v33 = vld [vmem:[#allocation2 + $0xd8] sm:$0xff]  ;;  %v1851_v42 = vld [vmem:[#allocation2 + $0xe8] sm:$0xff] }
  0x4e   :  { %277 = vmatmul.f32.gmra.mxu0 %v1761_v34  ;;  %342 = vmatmul.f32.gmra.mxu1 %v1763_v35  ;;  %v930_v36 = vld [vmem:[#allocation8 + $0x2f0] sm:$0xff]  ;;  %v928_v44 = vld [vmem:[#allocation8 + $0x2e0] sm:$0xff] }
  0x4f   :  { %407 = vmatmul.f32.gmra.mxu2 %v1761_v34  ;;  %585 = vmatpush.msrb.mxu1 %v208_v45  ;;  %v866_v37 = vld [vmem:[#allocation8 + $0xf0] sm:$0xff]  ;;  %v864_v45 = vld [vmem:[#allocation8 + $0xe0] sm:$0xff] }
  0x50   :  { %472 = vmatmul.f32.gmra.mxu3 %v1763_v35  ;;  %651 = vmatpush.msrb.mxu2 %v141_v48  ;;  %v962_v38 = vld [vmem:[#allocation8 + $0x3f0] sm:$0xff]  ;;  %v960_v48 = vld [vmem:[#allocation8 + $0x3e0] sm:$0xff] }
  0x51   :  { %716 = vmatpush.msrb.mxu3 %v205_v49  ;;  %521 = vmatpush.msrb.mxu0 %v140_v50  ;;  %v898_v43 = vld [vmem:[#allocation8 + $0x1f0] sm:$0xff] }
  0x52   :  { %586 = vmatpush.msrb.mxu1 %v204_v51  ;;  %652 = vmatpush.msrb.mxu2 %v137_v54  ;;  %v1857_v49 = vld [vmem:[#allocation2 + $0xf0] sm:$0xff]  ;;  %v1859_v50 = vld [vmem:[#allocation2 + $0xf8] sm:$0xff]  ;;  %v896_v51 = vld [vmem:[#allocation8 + $0x1e0] sm:$0xff] }
  0x53   :  { %717 = vmatpush.msrb.mxu3 %v201_v55  ;;  %522 = vmatpush.msrb.mxu0 %v136_v56  ;;  %v926_v54 = vld [vmem:[#allocation8 + $0x2d0] sm:$0xff] }
  0x54   :  { %587 = vmatpush.msrb.mxu1 %v200_v57  ;;  %653 = vmatpush.msrb.mxu2 %v133_v60  ;;  %v862_v55 = vld [vmem:[#allocation8 + $0xd0] sm:$0xff] }
  0x55   :  { %718 = vmatpush.msrb.mxu3 %v197_v61  ;;  %523 = vmatpush.msrb.mxu0 %v132_v62  ;;  %v958_v56 = vld [vmem:[#allocation8 + $0x3d0] sm:$0xff]  ;;  %v1869_v62 = vld [vmem:[#allocation7] sm:$0xf] }
  0x56   :  { %280 = vmatmul.f32.gmra.mxu0 %v1769_v40  ;;  %345 = vmatmul.f32.gmra.mxu1 %v1771_v41  ;;  %v894_v61 = vld [vmem:[#allocation8 + $0x1d0] sm:$0xff] }
  0x57   :  { %410 = vmatmul.f32.gmra.mxu2 %v1769_v40  ;;  %588 = vmatpush.msrb.mxu1 %v196_v1  ;;  %v1875_v1 = vperm.slane %v1869_v62, 1 }
  0x58   :  { %475 = vmatmul.f32.gmra.mxu3 %v1771_v41  ;;  %654 = vmatpush.msrb.mxu2 %v129_v4  ;;  %v924_v4 = vld [vmem:[#allocation8 + $0x2c0] sm:$0xff] }
  0x59   :  { %719 = vmatpush.msrb.mxu3 %v193_v5  ;;  %524 = vmatpush.msrb.mxu0 %v128_v6  ;;  %v860_v5 = vld [vmem:[#allocation8 + $0xc0] sm:$0xff] }
  0x5a   :  { %589 = vmatpush.msrb.mxu1 %v192_v7  ;;  %655 = vmatpush.msrb.mxu2 %v125_v10  ;;  %v956_v6 = vld [vmem:[#allocation8 + $0x3c0] sm:$0xff] }
  0x5b   :  { %720 = vmatpush.msrb.mxu3 %v189_v11  ;;  %525 = vmatpush.msrb.mxu0 %v124_v12 }
  0x5c   :  { %590 = vmatpush.msrb.mxu1 %v188_v15  ;;  %656 = vmatpush.msrb.mxu2 %v121_v18  ;;  %v892_v15 = vld [vmem:[#allocation8 + $0x1c0] sm:$0xff] }
  0x5d   :  { %721 = vmatpush.msrb.mxu3 %v185_v19  ;;  %526 = vmatpush.msrb.mxu0 %v120_v20  ;;  %v858_v19 = vld [vmem:[#allocation8 + $0xb0] sm:$0xff] }
  0x5e   :  { %283 = vmatmul.f32.gmra.mxu0 %v1777_v46  ;;  %348 = vmatmul.f32.gmra.mxu1 %v1779_v47  ;;  %v954_v20 = vld [vmem:[#allocation8 + $0x3b0] sm:$0xff] }
  0x5f   :  { %413 = vmatmul.f32.gmra.mxu2 %v1777_v46  ;;  %591 = vmatpush.msrb.mxu1 %v184_v21 }
  0x60   :  { %478 = vmatmul.f32.gmra.mxu3 %v1779_v47  ;;  %657 = vmatpush.msrb.mxu2 %v117_v24 }
  0x61   :  { %722 = vmatpush.msrb.mxu3 %v181_v25  ;;  %527 = vmatpush.msrb.mxu0 %v116_v26 }
  0x62   :  { %592 = vmatpush.msrb.mxu1 %v180_v31  ;;  %1100 = vmatpush.msra.mxu2 %v930_v36  ;;  %v890_v31 = vld [vmem:[#allocation8 + $0x1b0] sm:$0xff] }
  0x63   :  { %970 = vmatpush.msra.mxu0 %v866_v37  ;;  %1165 = vmatpush.msra.mxu3 %v962_v38  ;;  %v952_v38 = vld [vmem:[#allocation8 + $0x3a0] sm:$0xff] }
  0x64   :  { %1035 = vmatpush.msra.mxu1 %v898_v43  ;;  %1101 = vmatpush.msra.mxu2 %v928_v44 }
  0x65   :  { %971 = vmatpush.msra.mxu0 %v864_v45  ;;  %1166 = vmatpush.msra.mxu3 %v960_v48 }
  0x66   :  { %286 = vmatmul.f32.gmra.mxu0 %v1785_v52  ;;  %351 = vmatmul.f32.gmra.mxu1 %v1787_v53 }
  0x67   :  { %416 = vmatmul.f32.gmra.mxu2 %v1785_v52  ;;  %1036 = vmatpush.msra.mxu1 %v896_v51  ;;  %v888_v51 = vld [vmem:[#allocation8 + $0x1a0] sm:$0xff] }
  0x68   :  { %481 = vmatmul.f32.gmra.mxu3 %v1787_v53  ;;  %1102 = vmatpush.msra.mxu2 %v926_v54 }
  0x69   :  { %972 = vmatpush.msra.mxu0 %v862_v55  ;;  %1167 = vmatpush.msra.mxu3 %v958_v56  ;;  %v950_v56 = vld [vmem:[#allocation8 + $0x390] sm:$0xff] }
  0x6a   :  { %1037 = vmatpush.msra.mxu1 %v894_v61  ;;  %1103 = vmatpush.msra.mxu2 %v924_v4 }
  0x6b   :  { %973 = vmatpush.msra.mxu0 %v860_v5  ;;  %1168 = vmatpush.msra.mxu3 %v956_v6 }
  0x6c   :  { %1038 = vmatpush.msra.mxu1 %v892_v15 }
  0x6d   :  { %974 = vmatpush.msra.mxu0 %v858_v19  ;;  %1169 = vmatpush.msra.mxu3 %v954_v20 }
  0x6e   :  { %289 = vmatmul.f32.gmra.mxu0 %v1793_v58  ;;  %354 = vmatmul.f32.gmra.mxu1 %v1795_v59 }
  0x6f   :  { %419 = vmatmul.f32.gmra.mxu2 %v1793_v58  ;;  %1039 = vmatpush.msra.mxu1 %v890_v31 }
  0x70   :  { %484 = vmatmul.f32.gmra.mxu3 %v1795_v59 }
  0x71   :  { %1170 = vmatpush.msra.mxu3 %v952_v38  ;;  %1040 = vmatpush.msra.mxu1 %v888_v51  ;;  %v882_v51 = vld [vmem:[#allocation8 + $0x170] sm:$0xff] }
  0x73   :  { %1171 = vmatpush.msra.mxu3 %v950_v56 }
  0x76   :  { %292 = vmatmul.f32.gmra.mxu0 %v1801_v2  ;;  %357 = vmatmul.f32.gmra.mxu1 %v1803_v3 }
  0x77   :  { %422 = vmatmul.f32.gmra.mxu2 %v1801_v2 }
  0x78   :  { %487 = vmatmul.f32.gmra.mxu3 %v1803_v3 }
  0x7e   :  { %295 = vmatmul.f32.gmra.mxu0 %v1809_v8  ;;  %360 = vmatmul.f32.gmra.mxu1 %v1811_v9 }
  0x7f   :  { %425 = vmatmul.f32.gmra.mxu2 %v1809_v8 }
  0x80   :  { %490 = vmatmul.f32.gmra.mxu3 %v1811_v9 }
  0x86   :  { %298 = vmatmul.f32.gmra.mxu0 %v1817_v16  ;;  %363 = vmatmul.f32.gmra.mxu1 %v1819_v17 }
  0x87   :  { %428 = vmatmul.f32.gmra.mxu2 %v1817_v16 }
  0x88   :  { %493 = vmatmul.f32.gmra.mxu3 %v1819_v17 }
  0x8e   :  { %301 = vmatmul.f32.gmra.mxu0 %v1825_v22  ;;  %366 = vmatmul.f32.gmra.mxu1 %v1827_v23 }
  0x8f   :  { %431 = vmatmul.f32.gmra.mxu2 %v1825_v22 }
  0x90   :  { %496 = vmatmul.f32.gmra.mxu3 %v1827_v23 }
  0x96   :  { %304 = vmatmul.f32.gmra.mxu0 %v1833_v29  ;;  %369 = vmatmul.f32.gmra.mxu1 %v1835_v30 }
  0x97   :  { %434 = vmatmul.f32.gmra.mxu2 %v1833_v29 }
  0x98   :  { %499 = vmatmul.f32.gmra.mxu3 %v1835_v30 }
  0x9e   :  { %307 = vmatmul.f32.gmra.mxu0 %v1841_v32  ;;  %372 = vmatmul.f32.gmra.mxu1 %v1843_v33 }
  0x9f   :  { %437 = vmatmul.f32.gmra.mxu2 %v1841_v32 }
  0xa0   :  { %502 = vmatmul.f32.gmra.mxu3 %v1843_v33 }
  0xa6   :  { %310 = vmatmul.f32.gmra.mxu0 %v1849_v39  ;;  %375 = vmatmul.f32.gmra.mxu1 %v1851_v42 }
  0xa7   :  { %440 = vmatmul.f32.gmra.mxu2 %v1849_v39 }
  0xa8   :  { %505 = vmatmul.f32.gmra.mxu3 %v1851_v42 }
  0xae   :  { %313 = vmatmul.f32.gmra.mxu0 %v1857_v49  ;;  %378 = vmatmul.f32.gmra.mxu1 %v1859_v50 }
  0xaf   :  { %443 = vmatmul.f32.gmra.mxu2 %v1857_v49 }
  0xb0   :  { %508 = vmatmul.f32.gmra.mxu3 %v1859_v50 }
  0xb3   :  { %v1865_v57 = vpop.f32.mrf.mxu0  ;;  %v1867_v60 = vpop.f32.mrf.mxu1 }
  0xb6   :  { %528 = vmatmul.f32.vlgmr.msrb.gmra.mxu0 %v1737_v63  ;;  %593 = vmatmul.f32.vlgmr.msrb.gmra.mxu1 %v1739_v0 }
  0xb7   :  { %658 = vmatmul.f32.vlgmr.msrb.gmra.mxu2 %v1737_v63 }
  0xb8   :  { %723 = vmatmul.f32.vlgmr.msrb.gmra.mxu3 %v1739_v0  ;;  %v922_v0 = vld [vmem:[#allocation8 + $0x2b0] sm:$0xff] }
  0xb9   :  { %1104 = vmatpush.msra.mxu2 %v922_v0 }
  0xba   :  { %v399_v7 = vpop.f32.mrf.mxu2 }
  0xbb   :  { %v400_v10 = vadd.f32 %v399_v7, %v1875_v1  ;;  %v1879_v11 = vpop.f32.mrf.mxu0  ;;  %v1881_v12 = vpop.f32.mrf.mxu1  ;;  %v886_v7 = vld [vmem:[#allocation8 + $0x190] sm:$0xff] }
  0xbc   :  { %v464_v63 = vpop.f32.mrf.mxu3  ;;  %1041 = vmatpush.msra.mxu1 %v886_v7 }
  0xbd   :  { %v1883_v18 = vadd.f32 %v464_v63, %v400_v10  ;;  %v948_v63 = vld [vmem:[#allocation8 + $0x380] sm:$0xff] }
  0xbe   :  { %531 = vmatmul.f32.gmra.mxu0 %v1745_v13  ;;  %596 = vmatmul.f32.gmra.mxu1 %v1747_v14 }
  0xbf   :  { %2735 = vst [vmem:[#allocation15_spill] sm:$0xff] %v1883_v18  ;;  %661 = vmatmul.f32.gmra.mxu2 %v1745_v13  ;;  %v920_v13 = vld [vmem:[#allocation8 + $0x2a0] sm:$0xff]  ;;  %1172 = vmatpush.msra.mxu3 %v948_v63  ;;  %v942_v63 = vld [vmem:[#allocation8 + $0x350] sm:$0xff] }
  0xc0   :  { %726 = vmatmul.f32.gmra.mxu3 %v1747_v14  ;;  %v856_v14 = vld [vmem:[#allocation8 + $0xa0] sm:$0xff]  ;;  %1105 = vmatpush.msra.mxu2 %v920_v13  ;;  %v946_v13 = vld [vmem:[#allocation8 + $0x370] sm:$0xff] }
  0xc1   :  { %975 = vmatpush.msra.mxu0 %v856_v14  ;;  %1173 = vmatpush.msra.mxu3 %v946_v13 }
  0xc2   :  { %v402_v21 = vpop.f32.mrf.mxu2 }
  0xc3   :  { %v403_v24 = vadd.f32 %v402_v21, %v1875_v1  ;;  %v1890_v25 = vpop.f32.mrf.mxu0  ;;  %v1892_v26 = vpop.f32.mrf.mxu1 }
  0xc4   :  { %v467_v36 = vpop.f32.mrf.mxu3 }
  0xc5   :  { %v1894_v37 = vadd.f32 %v467_v36, %v403_v24  ;;  %v884_v24 = vld [vmem:[#allocation8 + $0x180] sm:$0xff] }
  0xc6   :  { %534 = vmatmul.f32.gmra.mxu0 %v1753_v27  ;;  %599 = vmatmul.f32.gmra.mxu1 %v1755_v28 }
  0xc7   :  { %664 = vmatmul.f32.gmra.mxu2 %v1753_v27  ;;  %v918_v27 = vld [vmem:[#allocation8 + $0x290] sm:$0xff]  ;;  %1042 = vmatpush.msra.mxu1 %v884_v24 }
  0xc8   :  { %729 = vmatmul.f32.gmra.mxu3 %v1755_v28  ;;  %v854_v28 = vld [vmem:[#allocation8 + $0x90] sm:$0xff]  ;;  %1106 = vmatpush.msra.mxu2 %v918_v27 }
  0xc9   :  { %976 = vmatpush.msra.mxu0 %v854_v28  ;;  %1043 = vmatpush.msra.mxu1 %v882_v51  ;;  %v944_v28 = vld [vmem:[#allocation8 + $0x360] sm:$0xff] }
  0xca   :  { %v405_v43 = vpop.f32.mrf.mxu2  ;;  %1174 = vmatpush.msra.mxu3 %v944_v28  ;;  %v938_v28 = vld [vmem:[#allocation8 + $0x330] sm:$0xff] }
  0xcb   :  { %v406_v44 = vadd.f32 %v405_v43, %v1875_v1  ;;  %v1901_v45 = vpop.f32.mrf.mxu0  ;;  %v1903_v48 = vpop.f32.mrf.mxu1 }
  0xcc   :  { %v470_v54 = vpop.f32.mrf.mxu3  ;;  %1175 = vmatpush.msra.mxu3 %v942_v63 }
  0xcd   :  { %v1905_v55 = vadd.f32 %v470_v54, %v406_v44 }
  0xce   :  { %537 = vmatmul.f32.gmra.mxu0 %v1761_v34  ;;  %602 = vmatmul.f32.gmra.mxu1 %v1763_v35 }
  0xcf   :  { %667 = vmatmul.f32.gmra.mxu2 %v1761_v34  ;;  %v916_v34 = vld [vmem:[#allocation8 + $0x280] sm:$0xff] }
  0xd0   :  { %732 = vmatmul.f32.gmra.mxu3 %v1763_v35  ;;  %v852_v35 = vld [vmem:[#allocation8 + $0x80] sm:$0xff]  ;;  %1107 = vmatpush.msra.mxu2 %v916_v34 }
  0xd1   :  { %977 = vmatpush.msra.mxu0 %v852_v35 }
  0xd2   :  { %v408_v61 = vpop.f32.mrf.mxu2 }
  0xd3   :  { %v409_v4 = vadd.f32 %v408_v61, %v1875_v1  ;;  %v1912_v5 = vpop.f32.mrf.mxu0  ;;  %v1914_v6 = vpop.f32.mrf.mxu1 }
  0xd4   :  { %v473_v10 = vpop.f32.mrf.mxu3 }
  0xd5   :  { %v1916_v15 = vadd.f32 %v473_v10, %v409_v4  ;;  %v880_v10 = vld [vmem:[#allocation8 + $0x160] sm:$0xff] }
  0xd6   :  { %540 = vmatmul.f32.gmra.mxu0 %v1769_v40  ;;  %605 = vmatmul.f32.gmra.mxu1 %v1771_v41 }
  0xd7   :  { %670 = vmatmul.f32.gmra.mxu2 %v1769_v40  ;;  %v914_v40 = vld [vmem:[#allocation8 + $0x270] sm:$0xff]  ;;  %1044 = vmatpush.msra.mxu1 %v880_v10 }
  0xd8   :  { %735 = vmatmul.f32.gmra.mxu3 %v1771_v41  ;;  %v850_v41 = vld [vmem:[#allocation8 + $0x70] sm:$0xff]  ;;  %1108 = vmatpush.msra.mxu2 %v914_v40 }
  0xd9   :  { %978 = vmatpush.msra.mxu0 %v850_v41  ;;  %v878_v40 = vld [vmem:[#allocation8 + $0x150] sm:$0xff] }
  0xda   :  { %v411_v0 = vpop.f32.mrf.mxu2  ;;  %1045 = vmatpush.msra.mxu1 %v878_v40  ;;  %v872_v40 = vld [vmem:[#allocation8 + $0x120] sm:$0xff] }
  0xdb   :  { %v412_v19 = vadd.f32 %v411_v0, %v1875_v1  ;;  %v1923_v20 = vpop.f32.mrf.mxu0  ;;  %v1925_v21 = vpop.f32.mrf.mxu1 }
  0xdc   :  { %v476_v31 = vpop.f32.mrf.mxu3 }
  0xdd   :  { %v1927_v36 = vadd.f32 %v476_v31, %v412_v19 }
  0xde   :  { %543 = vmatmul.f32.gmra.mxu0 %v1777_v46  ;;  %608 = vmatmul.f32.gmra.mxu1 %v1779_v47 }
  0xdf   :  { %673 = vmatmul.f32.gmra.mxu2 %v1777_v46  ;;  %v912_v46 = vld [vmem:[#allocation8 + $0x260] sm:$0xff] }
  0xe0   :  { %738 = vmatmul.f32.gmra.mxu3 %v1779_v47  ;;  %v848_v47 = vld [vmem:[#allocation8 + $0x60] sm:$0xff]  ;;  %1109 = vmatpush.msra.mxu2 %v912_v46 }
  0xe1   :  { %979 = vmatpush.msra.mxu0 %v848_v47  ;;  %v876_v46 = vld [vmem:[#allocation8 + $0x140] sm:$0xff] }
  0xe2   :  { %v414_v14 = vpop.f32.mrf.mxu2  ;;  %1046 = vmatpush.msra.mxu1 %v876_v46 }
  0xe3   :  { %v415_v38 = vadd.f32 %v414_v14, %v1875_v1  ;;  %v1934_v43 = vpop.f32.mrf.mxu0  ;;  %v1936_v44 = vpop.f32.mrf.mxu1  ;;  %v940_v14 = vld [vmem:[#allocation8 + $0x340] sm:$0xff] }
  0xe4   :  { %v479_v54 = vpop.f32.mrf.mxu3  ;;  %1176 = vmatpush.msra.mxu3 %v940_v14 }
  0xe5   :  { %v1938_v27 = vadd.f32 %v479_v54, %v415_v38 }
  0xe6   :  { %546 = vmatmul.f32.gmra.mxu0 %v1785_v52  ;;  %611 = vmatmul.f32.gmra.mxu1 %v1787_v53 }
  0xe7   :  { %676 = vmatmul.f32.gmra.mxu2 %v1785_v52  ;;  %v910_v52 = vld [vmem:[#allocation8 + $0x250] sm:$0xff]  ;;  %1177 = vmatpush.msra.mxu3 %v938_v28  ;;  %v836_v28 = vld [vmem:[#allocation8] sm:$0xff] }
  0xe8   :  { %741 = vmatmul.f32.gmra.mxu3 %v1787_v53  ;;  %v846_v53 = vld [vmem:[#allocation8 + $0x50] sm:$0xff]  ;;  %1110 = vmatpush.msra.mxu2 %v910_v52 }
  0xe9   :  { %980 = vmatpush.msra.mxu0 %v846_v53  ;;  %v936_v53 = vld [vmem:[#allocation8 + $0x320] sm:$0xff] }
  0xea   :  { %v417_v56 = vpop.f32.mrf.mxu2  ;;  %1178 = vmatpush.msra.mxu3 %v936_v53 }
  0xeb   :  { %v418_v61 = vadd.f32 %v417_v56, %v1875_v1  ;;  %v1945_v4 = vpop.f32.mrf.mxu0  ;;  %v1947_v7 = vpop.f32.mrf.mxu1 }
  0xec   :  { %v482_v34 = vpop.f32.mrf.mxu3 }
  0xed   :  { %v1949_v35 = vadd.f32 %v482_v34, %v418_v61  ;;  %v874_v34 = vld [vmem:[#allocation8 + $0x130] sm:$0xff] }
  0xee   :  { %549 = vmatmul.f32.gmra.mxu0 %v1793_v58  ;;  %614 = vmatmul.f32.gmra.mxu1 %v1795_v59 }
  0xef   :  { %679 = vmatmul.f32.gmra.mxu2 %v1793_v58  ;;  %v908_v58 = vld [vmem:[#allocation8 + $0x240] sm:$0xff]  ;;  %1047 = vmatpush.msra.mxu1 %v874_v34 }
  0xf0   :  { %744 = vmatmul.f32.gmra.mxu3 %v1795_v59  ;;  %v844_v59 = vld [vmem:[#allocation8 + $0x40] sm:$0xff]  ;;  %1111 = vmatpush.msra.mxu2 %v908_v58  ;;  %v934_v58 = vld [vmem:[#allocation8 + $0x310] sm:$0xff] }
  0xf1   :  { %981 = vmatpush.msra.mxu0 %v844_v59  ;;  %1048 = vmatpush.msra.mxu1 %v872_v40  ;;  %v932_v34 = vld [vmem:[#allocation8 + $0x300] sm:$0xff] }
  0xf2   :  { %v420_v0 = vpop.f32.mrf.mxu2  ;;  %1179 = vmatpush.msra.mxu3 %v934_v58 }
  0xf3   :  { %v421_v19 = vadd.f32 %v420_v0, %v1875_v1  ;;  %v1956_v24 = vpop.f32.mrf.mxu0  ;;  %v1958_v31 = vpop.f32.mrf.mxu1 }
  0xf4   :  { %v485_v41 = vpop.f32.mrf.mxu3  ;;  %1180 = vmatpush.msra.mxu3 %v932_v34  ;;  %v961_v34 = vld [vmem:[#allocation8 + $0x3e8] sm:$0xff] }
  0xf5   :  { %v1960_v13 = vadd.f32 %v485_v41, %v421_v19 }
  0xf6   :  { %552 = vmatmul.f32.gmra.mxu0 %v1801_v2  ;;  %617 = vmatmul.f32.gmra.mxu1 %v1803_v3 }
  0xf7   :  { %682 = vmatmul.f32.gmra.mxu2 %v1801_v2  ;;  %v906_v2 = vld [vmem:[#allocation8 + $0x230] sm:$0xff] }
  0xf8   :  { %747 = vmatmul.f32.gmra.mxu3 %v1803_v3  ;;  %v842_v3 = vld [vmem:[#allocation8 + $0x30] sm:$0xff]  ;;  %1112 = vmatpush.msra.mxu2 %v906_v2 }
  0xf9   :  { %982 = vmatpush.msra.mxu0 %v842_v3  ;;  %v870_v2 = vld [vmem:[#allocation8 + $0x110] sm:$0xff] }
  0xfa   :  { %v1966_v38 = vpop.f32.mrf.mxu2  ;;  %1049 = vmatpush.msra.mxu1 %v870_v2 }
  0xfb   :  { %v1968_v51 = vpop.f32.mrf.mxu0  ;;  %v1970_v54 = vpop.f32.mrf.mxu1 }
  0xfc   :  { %v1972_v47 = vpop.f32.mrf.mxu3 }
  0xfe   :  { %555 = vmatmul.f32.gmra.mxu0 %v1809_v8  ;;  %620 = vmatmul.f32.gmra.mxu1 %v1811_v9 }
  0xff   :  { %685 = vmatmul.f32.gmra.mxu2 %v1809_v8  ;;  %v904_v8 = vld [vmem:[#allocation8 + $0x220] sm:$0xff] }
 0x100   :  { %750 = vmatmul.f32.gmra.mxu3 %v1811_v9  ;;  %v840_v9 = vld [vmem:[#allocation8 + $0x20] sm:$0xff]  ;;  %1113 = vmatpush.msra.mxu2 %v904_v8 }
 0x101   :  { %983 = vmatpush.msra.mxu0 %v840_v9 }
 0x102   :  { %v1978_v56 = vpop.f32.mrf.mxu2 }
 0x103   :  { %v1980_v61 = vpop.f32.mrf.mxu0  ;;  %v1982_v10 = vpop.f32.mrf.mxu1 }
 0x104   :  { %v1984_v52 = vpop.f32.mrf.mxu3 }
 0x106   :  { %558 = vmatmul.f32.gmra.mxu0 %v1817_v16  ;;  %623 = vmatmul.f32.gmra.mxu1 %v1819_v17 }
 0x107   :  { %688 = vmatmul.f32.gmra.mxu2 %v1817_v16  ;;  %v902_v16 = vld [vmem:[#allocation8 + $0x210] sm:$0xff] }
 0x108   :  { %753 = vmatmul.f32.gmra.mxu3 %v1819_v17  ;;  %v838_v17 = vld [vmem:[#allocation8 + $0x10] sm:$0xff]  ;;  %1114 = vmatpush.msra.mxu2 %v902_v16  ;;  %v963_v16 = vld [vmem:[#allocation8 + $0x3f8] sm:$0xff] }
 0x109   :  { %984 = vmatpush.msra.mxu0 %v838_v17  ;;  %1425 = vmatpush.msrb.mxu3 %v963_v16 }
 0x10a   :  { %v1990_v63 = vpop.f32.mrf.mxu2 }
 0x10b   :  { %v1992_v0 = vpop.f32.mrf.mxu0  ;;  %v1994_v19 = vpop.f32.mrf.mxu1  ;;  %985 = vmatpush.msra.mxu0 %v836_v28  ;;  %v899_v28 = vld [vmem:[#allocation8 + $0x1f8] sm:$0xff]  ;;  %1426 = vmatpush.msrb.mxu3 %v961_v34 }
 0x10c   :  { %v1996_v41 = vpop.f32.mrf.mxu3  ;;  %v959_v34 = vld [vmem:[#allocation8 + $0x3d8] sm:$0xff] }
 0x10d   :  { %1427 = vmatpush.msrb.mxu3 %v959_v34 }
 0x10e   :  { %561 = vmatmul.f32.gmra.mxu0 %v1825_v22  ;;  %626 = vmatmul.f32.gmra.mxu1 %v1827_v23 }
 0x10f   :  { %691 = vmatmul.f32.gmra.mxu2 %v1825_v22  ;;  %v868_v22 = vld [vmem:[#allocation8 + $0x100] sm:$0xff] }
 0x110   :  { %756 = vmatmul.f32.gmra.mxu3 %v1827_v23  ;;  %1050 = vmatpush.msra.mxu1 %v868_v22  ;;  %v900_v23 = vld [vmem:[#allocation8 + $0x200] sm:$0xff] }
 0x111   :  { %1115 = vmatpush.msra.mxu2 %v900_v23  ;;  %v865_v23 = vld [vmem:[#allocation8 + $0xe8] sm:$0xff] }
 0x112   :  { %v2002_v59 = vpop.f32.mrf.mxu2  ;;  %1295 = vmatpush.msrb.mxu1 %v899_v28  ;;  %v897_v28 = vld [vmem:[#allocation8 + $0x1e8] sm:$0xff] }
 0x113   :  { %v2004_v14 = vpop.f32.mrf.mxu0  ;;  %v2006_v46 = vpop.f32.mrf.mxu1 }
 0x114   :  { %v2008_v3 = vpop.f32.mrf.mxu3  ;;  %1296 = vmatpush.msrb.mxu1 %v897_v28 }
 0x116   :  { %564 = vmatmul.f32.gmra.mxu0 %v1833_v29  ;;  %629 = vmatmul.f32.gmra.mxu1 %v1835_v30 }
 0x117   :  { %694 = vmatmul.f32.gmra.mxu2 %v1833_v29  ;;  %v931_v29 = vld [vmem:[#allocation8 + $0x2f8] sm:$0xff] }
 0x118   :  { %759 = vmatmul.f32.gmra.mxu3 %v1835_v30  ;;  %1360 = vmatpush.msrb.mxu2 %v931_v29  ;;  %v867_v30 = vld [vmem:[#allocation8 + $0xf8] sm:$0xff] }
 0x119   :  { %1230 = vmatpush.msrb.mxu0 %v867_v30 }
 0x11a   :  { %v2014_v8 = vpop.f32.mrf.mxu2 }
 0x11b   :  { %v2016_v9 = vpop.f32.mrf.mxu0  ;;  %v2018_v53 = vpop.f32.mrf.mxu1  ;;  %1231 = vmatpush.msrb.mxu0 %v865_v23  ;;  %v927_v23 = vld [vmem:[#allocation8 + $0x2d8] sm:$0xff] }
 0x11c   :  { %v2020_v40 = vpop.f32.mrf.mxu3 }
 0x11e   :  { %567 = vmatmul.f32.gmra.mxu0 %v1841_v32  ;;  %632 = vmatmul.f32.gmra.mxu1 %v1843_v33 }
 0x11f   :  { %697 = vmatmul.f32.gmra.mxu2 %v1841_v32  ;;  %v2038_v32 = vperm.slane %v1869_v62, 0 }
 0x120   :  { %762 = vmatmul.f32.gmra.mxu3 %v1843_v33  ;;  %v929_v33 = vld [vmem:[#allocation8 + $0x2e8] sm:$0xff] }
 0x121   :  { %1361 = vmatpush.msrb.mxu2 %v929_v33  ;;  %v2059_v33 = vperm.slane %v1869_v62, 2 }
 0x122   :  { %v2026_v17 = vpop.f32.mrf.mxu2 }
 0x123   :  { %v2028_v58 = vpop.f32.mrf.mxu0  ;;  %v2030_v2 = vpop.f32.mrf.mxu1  ;;  %1362 = vmatpush.msrb.mxu2 %v927_v23 }
 0x124   :  { %2736 = vst [vmem:[#allocation16_spill] sm:$0xff] %v2030_v2  ;;  %v2032_v22 = vpop.f32.mrf.mxu3 }
 0x126   :  { %570 = vmatmul.f32.gmra.mxu0 %v1849_v39  ;;  %635 = vmatmul.f32.gmra.mxu1 %v1851_v42 }
 0x127   :  { %700 = vmatmul.f32.gmra.mxu2 %v1849_v39  ;;  %v270_v39 = vadd.f32 %v1865_v57, %v2038_v32  ;;  %v863_v57 = vld [vmem:[#allocation8 + $0xd8] sm:$0xff] }
 0x128   :  { %765 = vmatmul.f32.gmra.mxu3 %v1851_v42  ;;  %1232 = vmatpush.msrb.mxu0 %v863_v57  ;;  %v2077_v57 = vperm.slane %v1869_v62, 3  ;;  %v893_v62 = vld [vmem:[#allocation8 + $0x1c8] sm:$0xff] }
 0x129   :  { %v2055_v42 = vadd.f32 %v1867_v60, %v270_v39  ;;  %v273_v60 = vadd.f32 %v1879_v11, %v2038_v32 }
 0x12a   :  { %v2041_v29 = vpop.f32.mrf.mxu2 }
 0x12b   :  { %2737 = vst [vmem:[#allocation17_spill] sm:$0xff] %v2041_v29  ;;  %v2043_v30 = vpop.f32.mrf.mxu0  ;;  %v2045_v16 = vpop.f32.mrf.mxu1  ;;  %v2080_v11 = vadd.f32 %v1881_v12, %v273_v60  ;;  %v276_v60 = vadd.f32 %v1890_v25, %v2038_v32 }
 0x12c   :  { %2738 = vst [vmem:[#allocation18_spill] sm:$0xff] %v2043_v30  ;;  %v2049_v2 = vpop.f32.mrf.mxu3 }
 0x12d   :  { %2739 = vst [vmem:[#allocation19_spill] sm:$0xff] %v2045_v16  ;;  %v2660_v12 = vmax.f32 %v2080_v11, 0.0  ;;  %v2101_v25 = vadd.f32 %v1892_v26, %v276_v60  ;;  %v891_v26 = vld [vmem:[#allocation8 + $0x1b8] sm:$0xff] }
 0x12e   :  { %2740 = vst [vmem:[#allocation20_spill] sm:$0xff] %v2049_v2  ;;  %573 = vmatmul.f32.gmra.mxu0 %v1857_v49  ;;  %638 = vmatmul.f32.gmra.mxu1 %v1859_v50  ;;  %v895_v2 = vld [vmem:[#allocation8 + $0x1d8] sm:$0xff] }
 0x12f   :  { %703 = vmatmul.f32.gmra.mxu2 %v1857_v49  ;;  %2741 = vst [vmem:[#allocation21_spill] sm:$0xff] %v2055_v42  ;;  %v2655_v49 = vmax.f32 %v2055_v42, 0.0  ;;  %1297 = vmatpush.msrb.mxu1 %v895_v2  ;;  %v957_v2 = vld [vmem:[#allocation8 + $0x3c8] sm:$0xff]  ;;  %v2665_v60 = vmax.f32 %v2101_v25, 0.0 }
 0x130   :  { %768 = vmatmul.f32.gmra.mxu3 %v1859_v50  ;;  %v2654_v50 = vmax.f32 %v1883_v18, 0.0 }
 0x131   :  { %1428 = vmatpush.msrb.mxu3 %v957_v2  ;;  %1298 = vmatpush.msrb.mxu1 %v893_v62 }
 0x132   :  { %v2061_v16 = vpop.f32.mrf.mxu2 }
 0x133   :  { %v529_v28 = vpop.f32.mrf.mxu0  ;;  %v594_v30 = vpop.f32.mrf.mxu1  ;;  %1299 = vmatpush.msrb.mxu1 %v891_v26 }
 0x134   :  { %v2067_v39 = vpop.f32.mrf.mxu3  ;;  %v530_v23 = vadd.f32 %v529_v28, %v2059_v33  ;;  %v861_v28 = vld [vmem:[#allocation8 + $0xc8] sm:$0xff] }
 0x135   :  { %2742 = vst [vmem:[#allocation22_spill] sm:$0xff] %v2067_v39  ;;  %v925_v39 = vld [vmem:[#allocation8 + $0x2c8] sm:$0xff]  ;;  %1233 = vmatpush.msrb.mxu0 %v861_v28 }
 0x136   :  { %v2070_v29 = vadd.f32 %v594_v30, %v530_v23  ;;  %986 = vmatmul.f32.vlgmr.msra.gmra.mxu0 %v2655_v49  ;;  %1051 = vmatmul.f32.vlgmr.msra.gmra.mxu1 %v2654_v50 }
 0x137   :  { %1363 = vmatpush.msrb.mxu2 %v925_v39  ;;  %v2659_v39 = vmax.f32 %v1894_v37, 0.0 }
 0x138   :  { %2743 = vst [vmem:[#allocation23_spill] sm:$0xff] %v2070_v29  ;;  %v2662_v34 = vmax.f32 %v2070_v29, 0.0 }
 0x13a   :  { %v659_v30 = vpop.f32.mrf.mxu2  ;;  %1116 = vmatmul.f32.vlgmr.msra.gmra.mxu2 %v2662_v34 }
 0x13b   :  { %v660_v23 = vadd.f32 %v659_v30, %v2077_v57  ;;  %v532_v50 = vpop.f32.mrf.mxu0  ;;  %v597_v49 = vpop.f32.mrf.mxu1 }
 0x13c   :  { %v533_v18 = vadd.f32 %v532_v50, %v2059_v33  ;;  %v724_v42 = vpop.f32.mrf.mxu3  ;;  %v923_v50 = vld [vmem:[#allocation8 + $0x2b8] sm:$0xff] }
 0x13d   :  { %v2091_v29 = vadd.f32 %v724_v42, %v660_v23  ;;  %1364 = vmatpush.msrb.mxu2 %v923_v50  ;;  %v955_v42 = vld [vmem:[#allocation8 + $0x3b8] sm:$0xff]  ;;  %v2664_v50 = vmax.f32 %v1905_v55, 0.0 }
 0x13e   :  { %v2093_v28 = vadd.f32 %v597_v49, %v533_v18  ;;  %989 = vmatmul.f32.gmra.mxu0 %v2660_v12  ;;  %1054 = vmatmul.f32.gmra.mxu1 %v2659_v39  ;;  %v859_v18 = vld [vmem:[#allocation8 + $0xb8] sm:$0xff]  ;;  %v279_v12 = vadd.f32 %v1901_v45, %v2038_v32 }
 0x13f   :  { %v2661_v2 = vmax.f32 %v2091_v29, 0.0  ;;  %1234 = vmatpush.msrb.mxu0 %v859_v18  ;;  %1429 = vmatpush.msrb.mxu3 %v955_v42 }
 0x140   :  { %2744 = vst [vmem:[#allocation24_spill] sm:$0xff] %v2093_v28  ;;  %v2667_v30 = vmax.f32 %v2093_v28, 0.0  ;;  %v2124_v45 = vadd.f32 %v1903_v48, %v279_v12  ;;  %v889_v48 = vld [vmem:[#allocation8 + $0x1a8] sm:$0xff] }
 0x141   :  { %1181 = vmatmul.f32.vlgmr.msra.gmra.mxu3 %v2661_v2  ;;  %1300 = vmatpush.msrb.mxu1 %v889_v48 }
 0x142   :  { %v662_v49 = vpop.f32.mrf.mxu2  ;;  %1119 = vmatmul.f32.gmra.mxu2 %v2667_v30  ;;  %v2670_v12 = vmax.f32 %v2124_v45, 0.0 }
 0x143   :  { %v663_v23 = vadd.f32 %v662_v49, %v2077_v57  ;;  %v535_v62 = vpop.f32.mrf.mxu0  ;;  %v600_v39 = vpop.f32.mrf.mxu1 }
 0x144   :  { %v536_v2 = vadd.f32 %v535_v62, %v2059_v33  ;;  %v727_v34 = vpop.f32.mrf.mxu3  ;;  %v921_v62 = vld [vmem:[#allocation8 + $0x2a8] sm:$0xff] }
 0x145   :  { %v2114_v28 = vadd.f32 %v727_v34, %v663_v23  ;;  %1365 = vmatpush.msrb.mxu2 %v921_v62  ;;  %v857_v34 = vld [vmem:[#allocation8 + $0xa8] sm:$0xff]  ;;  %v2669_v62 = vmax.f32 %v1916_v15, 0.0 }
 0x146   :  { %v2116_v18 = vadd.f32 %v600_v39, %v536_v2  ;;  %992 = vmatmul.f32.gmra.mxu0 %v2665_v60  ;;  %1057 = vmatmul.f32.gmra.mxu1 %v2664_v50  ;;  %v953_v39 = vld [vmem:[#allocation8 + $0x3a8] sm:$0xff]  ;;  %v282_v60 = vadd.f32 %v1912_v5, %v2038_v32 }
 0x147   :  { %v2666_v42 = vmax.f32 %v2114_v28, 0.0  ;;  %1235 = vmatpush.msrb.mxu0 %v857_v34  ;;  %1430 = vmatpush.msrb.mxu3 %v953_v39 }
 0x148   :  { %2745 = vst [vmem:[#allocation25_spill] sm:$0xff] %v2116_v18  ;;  %v2672_v49 = vmax.f32 %v2116_v18, 0.0  ;;  %v2147_v5 = vadd.f32 %v1914_v6, %v282_v60  ;;  %v887_v6 = vld [vmem:[#allocation8 + $0x198] sm:$0xff] }
 0x149   :  { %1184 = vmatmul.f32.gmra.mxu3 %v2666_v42  ;;  %1301 = vmatpush.msrb.mxu1 %v887_v6 }
 0x14a   :  { %v665_v2 = vpop.f32.mrf.mxu2  ;;  %1122 = vmatmul.f32.gmra.mxu2 %v2672_v49  ;;  %v2675_v60 = vmax.f32 %v2147_v5, 0.0 }
 0x14b   :  { %v666_v23 = vadd.f32 %v665_v2, %v2077_v57  ;;  %v538_v26 = vpop.f32.mrf.mxu0  ;;  %v603_v50 = vpop.f32.mrf.mxu1 }
 0x14c   :  { %v539_v42 = vadd.f32 %v538_v26, %v2059_v33  ;;  %v730_v30 = vpop.f32.mrf.mxu3  ;;  %v919_v26 = vld [vmem:[#allocation8 + $0x298] sm:$0xff] }
 0x14d   :  { %v2137_v18 = vadd.f32 %v730_v30, %v666_v23  ;;  %1366 = vmatpush.msrb.mxu2 %v919_v26  ;;  %v855_v30 = vld [vmem:[#allocation8 + $0x98] sm:$0xff]  ;;  %v2674_v26 = vmax.f32 %v1927_v36, 0.0 }
 0x14e   :  { %v2139_v34 = vadd.f32 %v603_v50, %v539_v42  ;;  %995 = vmatmul.f32.gmra.mxu0 %v2670_v12  ;;  %1060 = vmatmul.f32.gmra.mxu1 %v2669_v62  ;;  %v951_v50 = vld [vmem:[#allocation8 + $0x398] sm:$0xff]  ;;  %v285_v12 = vadd.f32 %v1923_v20, %v2038_v32 }
 0x14f   :  { %v2671_v39 = vmax.f32 %v2137_v18, 0.0  ;;  %1236 = vmatpush.msrb.mxu0 %v855_v30  ;;  %1431 = vmatpush.msrb.mxu3 %v951_v50 }
 0x150   :  { %2746 = vst [vmem:[#allocation26_spill] sm:$0xff] %v2139_v34  ;;  %v2677_v2 = vmax.f32 %v2139_v34, 0.0  ;;  %v2170_v20 = vadd.f32 %v1925_v21, %v285_v12  ;;  %v885_v21 = vld [vmem:[#allocation8 + $0x188] sm:$0xff] }
 0x151   :  { %1187 = vmatmul.f32.gmra.mxu3 %v2671_v39  ;;  %1302 = vmatpush.msrb.mxu1 %v885_v21 }
 0x152   :  { %v668_v42 = vpop.f32.mrf.mxu2  ;;  %1125 = vmatmul.f32.gmra.mxu2 %v2677_v2  ;;  %v2680_v12 = vmax.f32 %v2170_v20, 0.0 }
 0x153   :  { %v669_v23 = vadd.f32 %v668_v42, %v2077_v57  ;;  %v541_v48 = vpop.f32.mrf.mxu0  ;;  %v606_v62 = vpop.f32.mrf.mxu1 }
 0x154   :  { %v542_v39 = vadd.f32 %v541_v48, %v2059_v33  ;;  %v733_v49 = vpop.f32.mrf.mxu3  ;;  %v917_v48 = vld [vmem:[#allocation8 + $0x288] sm:$0xff] }
 0x155   :  { %v2160_v34 = vadd.f32 %v733_v49, %v669_v23  ;;  %1367 = vmatpush.msrb.mxu2 %v917_v48  ;;  %v853_v49 = vld [vmem:[#allocation8 + $0x88] sm:$0xff]  ;;  %v2679_v48 = vmax.f32 %v1938_v27, 0.0 }
 0x156   :  { %v2162_v30 = vadd.f32 %v606_v62, %v542_v39  ;;  %998 = vmatmul.f32.gmra.mxu0 %v2675_v60  ;;  %1063 = vmatmul.f32.gmra.mxu1 %v2674_v26  ;;  %v949_v62 = vld [vmem:[#allocation8 + $0x388] sm:$0xff]  ;;  %v288_v60 = vadd.f32 %v1934_v43, %v2038_v32 }
 0x157   :  { %v2676_v50 = vmax.f32 %v2160_v34, 0.0  ;;  %1237 = vmatpush.msrb.mxu0 %v853_v49  ;;  %1432 = vmatpush.msrb.mxu3 %v949_v62 }
 0x158   :  { %2747 = vst [vmem:[#allocation27_spill] sm:$0xff] %v2162_v30  ;;  %v2682_v42 = vmax.f32 %v2162_v30, 0.0  ;;  %v2193_v43 = vadd.f32 %v1936_v44, %v288_v60  ;;  %v883_v44 = vld [vmem:[#allocation8 + $0x178] sm:$0xff] }
 0x159   :  { %1190 = vmatmul.f32.gmra.mxu3 %v2676_v50  ;;  %1303 = vmatpush.msrb.mxu1 %v883_v44 }
 0x15a   :  { %v671_v39 = vpop.f32.mrf.mxu2  ;;  %1128 = vmatmul.f32.gmra.mxu2 %v2682_v42  ;;  %v2685_v60 = vmax.f32 %v2193_v43, 0.0 }
 0x15b   :  { %v672_v23 = vadd.f32 %v671_v39, %v2077_v57  ;;  %v544_v6 = vpop.f32.mrf.mxu0  ;;  %v609_v26 = vpop.f32.mrf.mxu1 }
 0x15c   :  { %v545_v50 = vadd.f32 %v544_v6, %v2059_v33  ;;  %v736_v2 = vpop.f32.mrf.mxu3  ;;  %v915_v6 = vld [vmem:[#allocation8 + $0x278] sm:$0xff] }
 0x15d   :  { %v2183_v30 = vadd.f32 %v736_v2, %v672_v23  ;;  %1368 = vmatpush.msrb.mxu2 %v915_v6  ;;  %v851_v2 = vld [vmem:[#allocation8 + $0x78] sm:$0xff]  ;;  %v2684_v6 = vmax.f32 %v1949_v35, 0.0 }
 0x15e   :  { %v2185_v49 = vadd.f32 %v609_v26, %v545_v50  ;;  %1001 = vmatmul.f32.gmra.mxu0 %v2680_v12  ;;  %1066 = vmatmul.f32.gmra.mxu1 %v2679_v48  ;;  %v947_v26 = vld [vmem:[#allocation8 + $0x378] sm:$0xff]  ;;  %v291_v12 = vadd.f32 %v1945_v4, %v2038_v32 }
 0x15f   :  { %v2681_v62 = vmax.f32 %v2183_v30, 0.0  ;;  %1238 = vmatpush.msrb.mxu0 %v851_v2  ;;  %1433 = vmatpush.msrb.mxu3 %v947_v26 }
 0x160   :  { %2748 = vst [vmem:[#allocation28_spill] sm:$0xff] %v2185_v49  ;;  %v2687_v39 = vmax.f32 %v2185_v49, 0.0  ;;  %v2216_v4 = vadd.f32 %v1947_v7, %v291_v12 }
 0x161   :  { %1193 = vmatmul.f32.gmra.mxu3 %v2681_v62 }
 0x162   :  { %v674_v50 = vpop.f32.mrf.mxu2  ;;  %1131 = vmatmul.f32.gmra.mxu2 %v2687_v39 }
 0x163   :  { %v675_v23 = vadd.f32 %v674_v50, %v2077_v57  ;;  %v547_v21 = vpop.f32.mrf.mxu0  ;;  %v612_v48 = vpop.f32.mrf.mxu1 }
 0x164   :  { %v548_v62 = vadd.f32 %v547_v21, %v2059_v33  ;;  %v739_v42 = vpop.f32.mrf.mxu3  ;;  %v913_v21 = vld [vmem:[#allocation8 + $0x268] sm:$0xff] }
 0x165   :  { %v2206_v49 = vadd.f32 %v739_v42, %v675_v23  ;;  %1369 = vmatpush.msrb.mxu2 %v913_v21  ;;  %v849_v42 = vld [vmem:[#allocation8 + $0x68] sm:$0xff]  ;;  %v294_v23 = vadd.f32 %v1956_v24, %v2038_v32  ;;  %v2689_v21 = vmax.f32 %v1960_v13, 0.0 }
 0x166   :  { %v2208_v2 = vadd.f32 %v612_v48, %v548_v62  ;;  %1004 = vmatmul.f32.gmra.mxu0 %v2685_v60  ;;  %1069 = vmatmul.f32.gmra.mxu1 %v2684_v6  ;;  %v945_v48 = vld [vmem:[#allocation8 + $0x368] sm:$0xff]  ;;  %v2691_v60 = vmax.f32 %v2216_v4, 0.0 }
 0x167   :  { %v2686_v26 = vmax.f32 %v2206_v49, 0.0  ;;  %1239 = vmatpush.msrb.mxu0 %v849_v42  ;;  %1434 = vmatpush.msrb.mxu3 %v945_v48  ;;  %v881_v6 = vld [vmem:[#allocation8 + $0x168] sm:$0xff]  ;;  %v2240_v48 = vadd.f32 %v1958_v31, %v294_v23 }
 0x168   :  { %v2688_v50 = vmax.f32 %v2208_v2, 0.0  ;;  %1304 = vmatpush.msrb.mxu1 %v881_v6 }
 0x169   :  { %1196 = vmatmul.f32.gmra.mxu3 %v2686_v26  ;;  %v424_v26 = vadd.f32 %v1966_v38, %v1875_v1 }
 0x16a   :  { %v677_v62 = vpop.f32.mrf.mxu2  ;;  %1134 = vmatmul.f32.gmra.mxu2 %v2688_v50 }
 0x16b   :  { %v678_v7 = vadd.f32 %v677_v62, %v2077_v57  ;;  %v550_v12 = vpop.f32.mrf.mxu0  ;;  %v615_v44 = vpop.f32.mrf.mxu1  ;;  %v2244_v38 = vadd.f32 %v1972_v47, %v424_v26 }
 0x16c   :  { %v551_v39 = vadd.f32 %v550_v12, %v2059_v33  ;;  %v742_v50 = vpop.f32.mrf.mxu3 }
 0x16d   :  { %v2231_v42 = vadd.f32 %v742_v50, %v678_v7  ;;  %v911_v50 = vld [vmem:[#allocation8 + $0x258] sm:$0xff] }
 0x16e   :  { %v2233_v24 = vadd.f32 %v615_v44, %v551_v39  ;;  %1007 = vmatmul.f32.gmra.mxu0 %v2691_v60  ;;  %1072 = vmatmul.f32.gmra.mxu1 %v2689_v21  ;;  %v847_v39 = vld [vmem:[#allocation8 + $0x58] sm:$0xff]  ;;  %v297_v21 = vadd.f32 %v1968_v51, %v2038_v32 }
 0x16f   :  { %v2690_v62 = vmax.f32 %v2231_v42, 0.0  ;;  %1370 = vmatpush.msrb.mxu2 %v911_v50  ;;  %v943_v7 = vld [vmem:[#allocation8 + $0x358] sm:$0xff]  ;;  %1240 = vmatpush.msrb.mxu0 %v847_v39  ;;  %v2694_v50 = vmax.f32 %v2244_v38, 0.0 }
 0x170   :  { %v2692_v6 = vmax.f32 %v2233_v24, 0.0  ;;  %1435 = vmatpush.msrb.mxu3 %v943_v7  ;;  %v879_v44 = vld [vmem:[#allocation8 + $0x158] sm:$0xff]  ;;  %v2269_v7 = vadd.f32 %v1970_v54, %v297_v21  ;;  %v300_v54 = vadd.f32 %v1980_v61, %v2038_v32 }
 0x171   :  { %1199 = vmatmul.f32.gmra.mxu3 %v2690_v62  ;;  %v427_v62 = vadd.f32 %v1978_v56, %v1875_v1  ;;  %1305 = vmatpush.msrb.mxu1 %v879_v44  ;;  %v877_v44 = vld [vmem:[#allocation8 + $0x148] sm:$0xff] }
 0x172   :  { %v680_v12 = vpop.f32.mrf.mxu2  ;;  %1137 = vmatmul.f32.gmra.mxu2 %v2692_v6 }
 0x173   :  { %v681_v23 = vadd.f32 %v680_v12, %v2077_v57  ;;  %v553_v47 = vpop.f32.mrf.mxu0  ;;  %v618_v26 = vpop.f32.mrf.mxu1  ;;  %v2749_v12 = vmax.f32 %v2240_v48, 0.0  ;;  %v2272_v56 = vadd.f32 %v1984_v52, %v427_v62  ;;  %1306 = vmatpush.msrb.mxu1 %v877_v44  ;;  %v875_v44 = vld [vmem:[#allocation8 + $0x138] sm:$0xff] }
 0x174   :  { %v554_v60 = vadd.f32 %v553_v47, %v2059_v33  ;;  %v745_v6 = vpop.f32.mrf.mxu3 }
 0x175   :  { %v2259_v39 = vadd.f32 %v745_v6, %v681_v23  ;;  %v909_v6 = vld [vmem:[#allocation8 + $0x248] sm:$0xff]  ;;  %1307 = vmatpush.msrb.mxu1 %v875_v44 }
 0x176   :  { %v2261_v31 = vadd.f32 %v618_v26, %v554_v60  ;;  %1010 = vmatmul.f32.gmra.mxu0 %v2749_v12  ;;  %1075 = vmatmul.f32.gmra.mxu1 %v2694_v50  ;;  %v845_v60 = vld [vmem:[#allocation8 + $0x48] sm:$0xff]  ;;  %v2698_v12 = vmax.f32 %v2269_v7, 0.0 }
 0x177   :  { %v2693_v51 = vmax.f32 %v2259_v39, 0.0  ;;  %1371 = vmatpush.msrb.mxu2 %v909_v6  ;;  %v941_v23 = vld [vmem:[#allocation8 + $0x348] sm:$0xff]  ;;  %1241 = vmatpush.msrb.mxu0 %v845_v60  ;;  %v2696_v6 = vmax.f32 %v2272_v56, 0.0 }
 0x178   :  { %v2695_v47 = vmax.f32 %v2261_v31, 0.0  ;;  %1436 = vmatpush.msrb.mxu3 %v941_v23  ;;  %v2296_v23 = vadd.f32 %v1982_v10, %v300_v54  ;;  %v873_v44 = vld [vmem:[#allocation8 + $0x128] sm:$0xff] }
 0x179   :  { %1202 = vmatmul.f32.gmra.mxu3 %v2693_v51  ;;  %v430_v51 = vadd.f32 %v1990_v63, %v1875_v1  ;;  %1308 = vmatpush.msrb.mxu1 %v873_v44  ;;  %v871_v44 = vld [vmem:[#allocation8 + $0x118] sm:$0xff] }
 0x17a   :  { %v683_v26 = vpop.f32.mrf.mxu2  ;;  %1140 = vmatmul.f32.gmra.mxu2 %v2695_v47 }
 0x17b   :  { %v684_v52 = vadd.f32 %v683_v26, %v2077_v57  ;;  %v556_v21 = vpop.f32.mrf.mxu0  ;;  %v621_v62 = vpop.f32.mrf.mxu1  ;;  %v2300_v63 = vadd.f32 %v1996_v41, %v430_v51  ;;  %1309 = vmatpush.msrb.mxu1 %v871_v44 }
 0x17c   :  { %v557_v50 = vadd.f32 %v556_v21, %v2059_v33  ;;  %v748_v47 = vpop.f32.mrf.mxu3 }
 0x17d   :  { %v2287_v60 = vadd.f32 %v748_v47, %v684_v52  ;;  %v907_v47 = vld [vmem:[#allocation8 + $0x238] sm:$0xff] }
 0x17e   :  { %v2289_v61 = vadd.f32 %v621_v62, %v557_v50  ;;  %1013 = vmatmul.f32.gmra.mxu0 %v2698_v12  ;;  %1078 = vmatmul.f32.gmra.mxu1 %v2696_v6  ;;  %v843_v50 = vld [vmem:[#allocation8 + $0x38] sm:$0xff]  ;;  %v303_v6 = vadd.f32 %v1992_v0, %v2038_v32 }
 0x17f   :  { %v2697_v26 = vmax.f32 %v2287_v60, 0.0  ;;  %1372 = vmatpush.msrb.mxu2 %v907_v47  ;;  %v939_v52 = vld [vmem:[#allocation8 + $0x338] sm:$0xff]  ;;  %1242 = vmatpush.msrb.mxu0 %v843_v50  ;;  %v2701_v47 = vmax.f32 %v2300_v63, 0.0 }
 0x180   :  { %v2699_v21 = vmax.f32 %v2289_v61, 0.0  ;;  %1437 = vmatpush.msrb.mxu3 %v939_v52  ;;  %v2325_v52 = vadd.f32 %v1994_v19, %v303_v6  ;;  %v306_v19 = vadd.f32 %v2004_v14, %v2038_v32 }
 0x181   :  { %1205 = vmatmul.f32.gmra.mxu3 %v2697_v26  ;;  %v433_v26 = vadd.f32 %v2002_v59, %v1875_v1 }
 0x182   :  { %v686_v62 = vpop.f32.mrf.mxu2  ;;  %1143 = vmatmul.f32.gmra.mxu2 %v2699_v21 }
 0x183   :  { %v687_v54 = vadd.f32 %v686_v62, %v2077_v57  ;;  %v559_v41 = vpop.f32.mrf.mxu0  ;;  %v624_v51 = vpop.f32.mrf.mxu1  ;;  %v2750_v62 = vmax.f32 %v2296_v23, 0.0  ;;  %v2328_v59 = vadd.f32 %v2008_v3, %v433_v26 }
 0x184   :  { %v560_v12 = vadd.f32 %v559_v41, %v2059_v33  ;;  %v751_v21 = vpop.f32.mrf.mxu3 }
 0x185   :  { %v2315_v50 = vadd.f32 %v751_v21, %v687_v54  ;;  %v905_v21 = vld [vmem:[#allocation8 + $0x228] sm:$0xff] }
 0x186   :  { %v2317_v10 = vadd.f32 %v624_v51, %v560_v12  ;;  %1016 = vmatmul.f32.gmra.mxu0 %v2750_v62  ;;  %1081 = vmatmul.f32.gmra.mxu1 %v2701_v47  ;;  %v841_v12 = vld [vmem:[#allocation8 + $0x28] sm:$0xff]  ;;  %v2705_v62 = vmax.f32 %v2325_v52, 0.0 }
 0x187   :  { %v2700_v0 = vmax.f32 %v2315_v50, 0.0  ;;  %1373 = vmatpush.msrb.mxu2 %v905_v21  ;;  %v937_v54 = vld [vmem:[#allocation8 + $0x328] sm:$0xff]  ;;  %1243 = vmatpush.msrb.mxu0 %v841_v12  ;;  %v2703_v21 = vmax.f32 %v2328_v59, 0.0 }
 0x188   :  { %v2702_v41 = vmax.f32 %v2317_v10, 0.0  ;;  %1438 = vmatpush.msrb.mxu3 %v937_v54  ;;  %v2352_v54 = vadd.f32 %v2006_v46, %v306_v19  ;;  %v837_v46 = vld [vmem:[#allocation8 + $0x8] sm:$0xff] }
 0x189   :  { %1208 = vmatmul.f32.gmra.mxu3 %v2700_v0  ;;  %v436_v0 = vadd.f32 %v2014_v8, %v1875_v1 }
 0x18a   :  { %v689_v51 = vpop.f32.mrf.mxu2  ;;  %1146 = vmatmul.f32.gmra.mxu2 %v2702_v41 }
 0x18b   :  { %v690_v3 = vadd.f32 %v689_v51, %v2077_v57  ;;  %v562_v6 = vpop.f32.mrf.mxu0  ;;  %v627_v26 = vpop.f32.mrf.mxu1  ;;  %v2356_v8 = vadd.f32 %v2020_v40, %v436_v0 }
 0x18c   :  { %v563_v47 = vadd.f32 %v562_v6, %v2059_v33  ;;  %v754_v41 = vpop.f32.mrf.mxu3 }
 0x18d   :  { %v2343_v12 = vadd.f32 %v754_v41, %v690_v3  ;;  %v903_v41 = vld [vmem:[#allocation8 + $0x218] sm:$0xff] }
 0x18e   :  { %v2345_v14 = vadd.f32 %v627_v26, %v563_v47  ;;  %1019 = vmatmul.f32.gmra.mxu0 %v2705_v62  ;;  %1084 = vmatmul.f32.gmra.mxu1 %v2703_v21  ;;  %v839_v47 = vld [vmem:[#allocation8 + $0x18] sm:$0xff]  ;;  %v309_v21 = vadd.f32 %v2016_v9, %v2038_v32 }
 0x18f   :  { %v2704_v51 = vmax.f32 %v2343_v12, 0.0  ;;  %1374 = vmatpush.msrb.mxu2 %v903_v41  ;;  %v935_v3 = vld [vmem:[#allocation8 + $0x318] sm:$0xff]  ;;  %1244 = vmatpush.msrb.mxu0 %v839_v47  ;;  %v2709_v41 = vmax.f32 %v2356_v8, 0.0 }
 0x190   :  { %2751 = vst [vmem:[#allocation29_spill] sm:$0xff] %v2345_v14  ;;  %v2706_v6 = vmax.f32 %v2345_v14, 0.0  ;;  %1439 = vmatpush.msrb.mxu3 %v935_v3  ;;  %v2753_v3 = vmax.f32 %v2352_v54, 0.0 }
 0x191   :  { %1211 = vmatmul.f32.gmra.mxu3 %v2704_v51  ;;  %v439_v51 = vadd.f32 %v2026_v17, %v1875_v1  ;;  %1245 = vmatpush.msrb.mxu0 %v837_v46  ;;  %v901_v17 = vld [vmem:[#allocation8 + $0x208] sm:$0xff]  ;;  %v312_v46 = vadd.f32 %v2028_v58, %v2038_v32 }
 0x192   :  { %v692_v26 = vpop.f32.mrf.mxu2  ;;  %1149 = vmatmul.f32.gmra.mxu2 %v2706_v6  ;;  %v2757_v58 = vld [vmem:[#allocation16_spill] sm:$0xff] }
 0x193   :  { %v693_v19 = vadd.f32 %v692_v26, %v2077_v57  ;;  %v565_v40 = vpop.f32.mrf.mxu0  ;;  %v630_v0 = vpop.f32.mrf.mxu1  ;;  %v869_v26 = vld [vmem:[#allocation8 + $0x108] sm:$0xff]  ;;  %1375 = vmatpush.msrb.mxu2 %v901_v17 }
 0x194   :  { %v566_v62 = vadd.f32 %v565_v40, %v2059_v33  ;;  %v757_v6 = vpop.f32.mrf.mxu3  ;;  %1310 = vmatpush.msrb.mxu1 %v869_v26  ;;  %v2381_v40 = vadd.f32 %v2018_v53, %v309_v21  ;;  %v2754_v26 = vld [vmem:[#allocation17_spill] sm:$0xff] }
 0x195   :  { %v2371_v47 = vadd.f32 %v757_v6, %v693_v19  ;;  %v2384_v6 = vadd.f32 %v2032_v22, %v439_v51  ;;  %v933_v19 = vld [vmem:[#allocation8 + $0x308] sm:$0xff] }
 0x196   :  { %v2373_v14 = vadd.f32 %v630_v0, %v566_v62  ;;  %1022 = vmatmul.f32.gmra.mxu0 %v2753_v3  ;;  %1087 = vmatmul.f32.gmra.mxu1 %v2709_v41  ;;  %v2714_v51 = vmax.f32 %v2381_v40, 0.0  ;;  %v442_v3 = vadd.f32 %v2754_v26, %v1875_v1 }
 0x197   :  { %v2708_v9 = vmax.f32 %v2371_v47, 0.0  ;;  %1440 = vmatpush.msrb.mxu3 %v933_v19  ;;  %v2712_v44 = vmax.f32 %v2384_v6, 0.0 }
 0x198   :  { %2752 = vst [vmem:[#allocation30_spill] sm:$0xff] %v2373_v14  ;;  %v2710_v62 = vmax.f32 %v2373_v14, 0.0  ;;  %v2758_v14 = vld [vmem:[#allocation20_spill] sm:$0xff] }
 0x199   :  { %1214 = vmatmul.f32.gmra.mxu3 %v2708_v9  ;;  %v2412_v26 = vadd.f32 %v2758_v14, %v442_v3  ;;  %v445_v3 = vadd.f32 %v2061_v16, %v1875_v1 }
 0x19a   :  { %v695_v0 = vpop.f32.mrf.mxu2  ;;  %1152 = vmatmul.f32.gmra.mxu2 %v2710_v62 }
 0x19b   :  { %v696_v53 = vadd.f32 %v695_v0, %v2077_v57  ;;  %v568_v21 = vpop.f32.mrf.mxu0  ;;  %v633_v22 = vpop.f32.mrf.mxu1  ;;  %v2408_v0 = vadd.f32 %v2757_v58, %v312_v46  ;;  %v2759_v58 = vld [vmem:[#allocation18_spill] sm:$0xff]  ;;  %v2718_v14 = vmax.f32 %v2412_v26, 0.0 }
 0x19c   :  { %v569_v17 = vadd.f32 %v568_v21, %v2059_v33  ;;  %v760_v9 = vpop.f32.mrf.mxu3 }
 0x19d   :  { %v2399_v41 = vadd.f32 %v760_v9, %v696_v53  ;;  %v2724_v53 = vmax.f32 %v2408_v0, 0.0 }
 0x19e   :  { %v2401_v19 = vadd.f32 %v633_v22, %v569_v17  ;;  %1025 = vmatmul.f32.gmra.mxu0 %v2714_v51  ;;  %1090 = vmatmul.f32.gmra.mxu1 %v2712_v44  ;;  %v315_v44 = vadd.f32 %v2759_v58, %v2038_v32 }
 0x19f   :  { %2755 = vst [vmem:[#allocation17_spill] sm:$0xff] %v2399_v41  ;;  %v2713_v62 = vmax.f32 %v2399_v41, 0.0 }
 0x1a0   :  { %2756 = vst [vmem:[#allocation31_spill] sm:$0xff] %v2401_v19  ;;  %v2716_v21 = vmax.f32 %v2401_v19, 0.0  ;;  %v2764_v19 = vld [vmem:[#allocation22_spill] sm:$0xff] }
 0x1a1   :  { %1217 = vmatmul.f32.gmra.mxu3 %v2713_v62  ;;  %v2440_v1 = vadd.f32 %v2764_v19, %v445_v3 }
 0x1a2   :  { %v698_v9 = vpop.f32.mrf.mxu2  ;;  %1155 = vmatmul.f32.gmra.mxu2 %v2716_v21 }
 0x1a3   :  { %v699_v22 = vadd.f32 %v698_v9, %v2077_v57  ;;  %v571_v46 = vpop.f32.mrf.mxu0  ;;  %v636_v17 = vpop.f32.mrf.mxu1  ;;  %v2762_v9 = vld [vmem:[#allocation19_spill] sm:$0xff] }
 0x1a4   :  { %v572_v62 = vadd.f32 %v571_v46, %v2059_v33  ;;  %v763_v51 = vpop.f32.mrf.mxu3  ;;  %v2437_v58 = vadd.f32 %v2762_v9, %v315_v44  ;;  %2765 = vst [vmem:[#allocation19_spill] sm:$0xff] %v2440_v1  ;;  %v2721_v44 = vmax.f32 %v2440_v1, 0.0 }
 0x1a5   :  { %v2427_v41 = vadd.f32 %v763_v51, %v699_v22 }
 0x1a6   :  { %v2429_v21 = vadd.f32 %v636_v17, %v572_v62  ;;  %1028 = vmatmul.f32.gmra.mxu0 %v2724_v53  ;;  %1093 = vmatmul.f32.gmra.mxu1 %v2718_v14  ;;  %2763 = vst [vmem:[#allocation18_spill] sm:$0xff] %v2437_v58  ;;  %v2722_v17 = vmax.f32 %v2437_v58, 0.0 }
 0x1a7   :  { %2760 = vst [vmem:[#allocation16_spill] sm:$0xff] %v2427_v41  ;;  %v2720_v32 = vmax.f32 %v2427_v41, 0.0 }
 0x1a8   :  { %2761 = vst [vmem:[#allocation20_spill] sm:$0xff] %v2429_v21  ;;  %v2719_v16 = vmax.f32 %v2429_v21, 0.0 }
 0x1a9   :  { %1220 = vmatmul.f32.gmra.mxu3 %v2720_v32 }
 0x1aa   :  { %v701_v62 = vpop.f32.mrf.mxu2  ;;  %1158 = vmatmul.f32.gmra.mxu2 %v2719_v16 }
 0x1ab   :  { %v702_v51 = vadd.f32 %v701_v62, %v2077_v57  ;;  %v574_v22 = vpop.f32.mrf.mxu0  ;;  %v639_v46 = vpop.f32.mrf.mxu1 }
 0x1ac   :  { %v575_v19 = vadd.f32 %v574_v22, %v2059_v33  ;;  %v766_v3 = vpop.f32.mrf.mxu3 }
 0x1ad   :  { %v2451_v9 = vadd.f32 %v766_v3, %v702_v51  ;;  %v2471_v3 = vld [vmem:[%s2652_s4] sm:$0x3] }
 0x1ae   :  { %v2453_v14 = vadd.f32 %v639_v46, %v575_v19  ;;  %1031 = vmatmul.f32.gmra.mxu0 %v2722_v17  ;;  %1096 = vmatmul.f32.gmra.mxu1 %v2721_v44  ;;  %2769 = vst [vmem:[#allocation34_spill] sm:$0xff] %v2471_v3  ;;  %v2770_v44 = vld [vmem:[#allocation21_spill] sm:$0xff] }
 0x1af   :  { %2766 = vst [vmem:[#allocation22_spill] sm:$0xff] %v2451_v9  ;;  %v2723_v62 = vmax.f32 %v2451_v9, 0.0  ;;  %v2771_v17 = vmax.f32 %v2770_v44, 0.0 }
 0x1b0   :  { %2767 = vst [vmem:[#allocation32_spill] sm:$0xff] %v2453_v14  ;;  %v2725_v16 = vmax.f32 %v2453_v14, 0.0 }
 0x1b1   :  { %1223 = vmatmul.f32.gmra.mxu3 %v2723_v62  ;;  %v2772_v62 = vld [vmem:[#allocation15_spill] sm:$0xff] }
 0x1b2   :  { %v704_v32 = vpop.f32.mrf.mxu2  ;;  %1161 = vmatmul.f32.gmra.mxu2 %v2725_v16  ;;  %v2773_v53 = vmax.f32 %v2772_v62, 0.0 }
 0x1b3   :  { %v705_v33 = vadd.f32 %v704_v32, %v2077_v57  ;;  %v987_v51 = vpop.f32.mrf.mxu0  ;;  %v1052_v22 = vpop.f32.mrf.mxu1  ;;  %v2479_v57 = vperm.slane %v2471_v3, 0  ;;  %v2774_v32 = vld [vmem:[#allocation23_spill] sm:$0xff]  ;;  %v2778_v3 = vmax.f32 %v2091_v29, 0.0 }
 0x1b4   :  { %v769_v46 = vpop.f32.mrf.mxu3 }
 0x1b5   :  { %v2466_v19 = vadd.f32 %v769_v46, %v705_v33  ;;  %v2775_v33 = vmax.f32 %v2774_v32, 0.0  ;;  %v988_v9 = vadd.f32 %v987_v51, %v2479_v57 }
 0x1b6   :  { %1246 = vmatmul.f32.vlgmr.msrb.gmra.mxu0 %v2771_v17  ;;  %1311 = vmatmul.f32.vlgmr.msrb.gmra.mxu1 %v2773_v53  ;;  %v2776_v17 = vmax.f32 %v2080_v11, 0.0  ;;  %v2777_v53 = vmax.f32 %v1894_v37, 0.0  ;;  %v2781_v11 = vmax.f32 %v2101_v25, 0.0  ;;  %v2782_v37 = vmax.f32 %v1905_v55, 0.0 }
 0x1b7   :  { %2768 = vst [vmem:[#allocation33_spill] sm:$0xff] %v2466_v19  ;;  %v2730_v16 = vmax.f32 %v2466_v19, 0.0  ;;  %v1053_v62 = vadd.f32 %v1052_v22, %v988_v9  ;;  %v2779_v19 = vld [vmem:[#allocation24_spill] sm:$0xff]  ;;  %v2783_v9 = vmax.f32 %v2114_v28, 0.0  ;;  %v2787_v55 = vmax.f32 %v1916_v15, 0.0 }
 0x1b8   :  { %v2792_v15 = vmax.f32 %v1927_v36, 0.0  ;;  %v2797_v36 = vmax.f32 %v1938_v27, 0.0  ;;  %v2802_v27 = vmax.f32 %v1949_v35, 0.0  ;;  %v2806_v35 = vmax.f32 %v1960_v13, 0.0 }
 0x1b9   :  { %1226 = vmatmul.f32.gmra.mxu3 %v2730_v16  ;;  %v2780_v16 = vmax.f32 %v2779_v19, 0.0  ;;  %v2810_v13 = vmax.f32 %v2244_v38, 0.0  ;;  %v2814_v38 = vmax.f32 %v2272_v56, 0.0  ;;  %v2818_v56 = vmax.f32 %v2300_v63, 0.0 }
 0x1ba   :  { %1376 = vmatmul.f32.vlgmr.msrb.gmra.mxu2 %v2775_v33  ;;  %v2822_v63 = vmax.f32 %v2328_v59, 0.0  ;;  %v2827_v59 = vmax.f32 %v2356_v8, 0.0  ;;  %v2832_v8 = vmax.f32 %v2384_v6, 0.0  ;;  %v2838_v6 = vmax.f32 %v2412_v26, 0.0  ;;  %v2845_v26 = vld [vmem:[#allocation19_spill] sm:$0xff] }
 0x1bb   :  { %v990_v46 = vpop.f32.mrf.mxu0  ;;  %v1055_v14 = vpop.f32.mrf.mxu1 }
 0x1bc   :  { %v991_v51 = vadd.f32 %v990_v46, %v2479_v57 }
 0x1bd   :  { %v1117_v44 = vpop.f32.mrf.mxu2 }
 0x1be   :  { %1249 = vmatmul.f32.gmra.mxu0 %v2776_v17  ;;  %1314 = vmatmul.f32.gmra.mxu1 %v2777_v53  ;;  %v1118_v32 = vadd.f32 %v1117_v44, %v1053_v62  ;;  %v1056_v29 = vadd.f32 %v1055_v14, %v991_v51  ;;  %v2786_v53 = vmax.f32 %v2124_v45, 0.0  ;;  %v2789_v14 = vld [vmem:[#allocation26_spill] sm:$0xff] }
 0x1c1   :  { %1441 = vmatmul.f32.vlgmr.msrb.gmra.mxu3 %v2778_v3 }
 0x1c2   :  { %1379 = vmatmul.f32.gmra.mxu2 %v2780_v16  ;;  %v2784_v16 = vld [vmem:[#allocation25_spill] sm:$0xff] }
 0x1c3   :  { %v993_v33 = vpop.f32.mrf.mxu0  ;;  %v1058_v1 = vpop.f32.mrf.mxu1  ;;  %v2785_v22 = vmax.f32 %v2784_v16, 0.0 }
 0x1c4   :  { %v1182_v58 = vpop.f32.mrf.mxu3 }
 0x1c5   :  { %v1183_v21 = vadd.f32 %v1182_v58, %v1118_v32  ;;  %v1120_v41 = vpop.f32.mrf.mxu2  ;;  %v994_v58 = vadd.f32 %v993_v33, %v2479_v57 }
 0x1c6   :  { %1252 = vmatmul.f32.gmra.mxu0 %v2781_v11  ;;  %1317 = vmatmul.f32.gmra.mxu1 %v2782_v37  ;;  %v1121_v19 = vadd.f32 %v1120_v41, %v1056_v29  ;;  %v2790_v41 = vmax.f32 %v2789_v14, 0.0  ;;  %v2791_v29 = vmax.f32 %v2147_v5, 0.0 }
 0x1c7   :  { %1490 = vst [vmem:[#allocation10] sm:$0xff] %v1183_v21  ;;  %v1059_v28 = vadd.f32 %v1058_v1, %v994_v58  ;;  %v2788_v21 = vmax.f32 %v2137_v18, 0.0  ;;  %v2793_v1 = vmax.f32 %v2160_v34, 0.0 }
 0x1c9   :  { %1444 = vmatmul.f32.gmra.mxu3 %v2783_v9  ;;  %v2794_v9 = vld [vmem:[#allocation27_spill] sm:$0xff] }
 0x1ca   :  { %1382 = vmatmul.f32.gmra.mxu2 %v2785_v22  ;;  %v2795_v16 = vmax.f32 %v2794_v9, 0.0  ;;  %v2805_v9 = vmax.f32 %v2216_v4, 0.0 }
 0x1cb   :  { %v996_v3 = vpop.f32.mrf.mxu0  ;;  %v1061_v44 = vpop.f32.mrf.mxu1 }
 0x1cc   :  { %v1185_v46 = vpop.f32.mrf.mxu3  ;;  %v997_v11 = vadd.f32 %v996_v3, %v2479_v57 }
 0x1cd   :  { %v1186_v17 = vadd.f32 %v1185_v46, %v1121_v19  ;;  %v1123_v25 = vpop.f32.mrf.mxu2 }
 0x1ce   :  { %1255 = vmatmul.f32.gmra.mxu0 %v2786_v53  ;;  %1320 = vmatmul.f32.gmra.mxu1 %v2787_v55  ;;  %v1124_v62 = vadd.f32 %v1123_v25, %v1059_v28  ;;  %v1062_v18 = vadd.f32 %v1061_v44, %v997_v11  ;;  %v2796_v25 = vmax.f32 %v2170_v20, 0.0  ;;  %v2798_v44 = vmax.f32 %v2183_v30, 0.0  ;;  %v2799_v53 = vld [vmem:[#allocation28_spill] sm:$0xff] }
 0x1cf   :  { %1492 = vst [vmem:[#allocation10 + $0x10] sm:$0xff] %v1186_v17  ;;  %v2800_v55 = vmax.f32 %v2799_v53, 0.0  ;;  %v2804_v11 = vmax.f32 %v2208_v2, 0.0  ;;  %v2808_v2 = vmax.f32 %v2233_v24, 0.0  ;;  %v2812_v24 = vmax.f32 %v2261_v31, 0.0 }
 0x1d0   :  { %v2816_v31 = vmax.f32 %v2289_v61, 0.0  ;;  %v2820_v61 = vmax.f32 %v2317_v10, 0.0  ;;  %v2824_v10 = vld [vmem:[#allocation29_spill] sm:$0xff] }
 0x1d1   :  { %1447 = vmatmul.f32.gmra.mxu3 %v2788_v21 }
 0x1d2   :  { %1385 = vmatmul.f32.gmra.mxu2 %v2790_v41 }
 0x1d3   :  { %v999_v32 = vpop.f32.mrf.mxu0  ;;  %v1064_v51 = vpop.f32.mrf.mxu1 }
 0x1d4   :  { %v1188_v33 = vpop.f32.mrf.mxu3  ;;  %v1000_v58 = vadd.f32 %v999_v32, %v2479_v57 }
 0x1d5   :  { %v1189_v37 = vadd.f32 %v1188_v33, %v1124_v62  ;;  %v1126_v45 = vpop.f32.mrf.mxu2  ;;  %v2801_v33 = vmax.f32 %v2193_v43, 0.0 }
 0x1d6   :  { %1258 = vmatmul.f32.gmra.mxu0 %v2791_v29  ;;  %1323 = vmatmul.f32.gmra.mxu1 %v2792_v15  ;;  %v1127_v22 = vadd.f32 %v1126_v45, %v1062_v18  ;;  %v1065_v34 = vadd.f32 %v1064_v51, %v1000_v58  ;;  %v2803_v51 = vmax.f32 %v2206_v49, 0.0 }
 0x1d7   :  { %1494 = vst [vmem:[#allocation10 + $0x20] sm:$0xff] %v1189_v37 }
 0x1d9   :  { %1450 = vmatmul.f32.gmra.mxu3 %v2793_v1 }
 0x1da   :  { %1388 = vmatmul.f32.gmra.mxu2 %v2795_v16  ;;  %v2807_v16 = vmax.f32 %v2231_v42, 0.0 }
 0x1db   :  { %v1002_v19 = vpop.f32.mrf.mxu0  ;;  %v1067_v46 = vpop.f32.mrf.mxu1 }
 0x1dc   :  { %v1191_v3 = vpop.f32.mrf.mxu3  ;;  %v1003_v62 = vadd.f32 %v1002_v19, %v2479_v57 }
 0x1dd   :  { %v1192_v17 = vadd.f32 %v1191_v3, %v1127_v22  ;;  %v1129_v5 = vpop.f32.mrf.mxu2 }
 0x1de   :  { %1261 = vmatmul.f32.gmra.mxu0 %v2796_v25  ;;  %1326 = vmatmul.f32.gmra.mxu1 %v2797_v36  ;;  %v1130_v28 = vadd.f32 %v1129_v5, %v1065_v34  ;;  %v1068_v30 = vadd.f32 %v1067_v46, %v1003_v62  ;;  %v2809_v5 = vmax.f32 %v2240_v48, 0.0  ;;  %v2811_v25 = vmax.f32 %v2259_v39, 0.0 }
 0x1df   :  { %1496 = vst [vmem:[#allocation10 + $0x30] sm:$0xff] %v1192_v17 }
 0x1e1   :  { %1453 = vmatmul.f32.gmra.mxu3 %v2798_v44 }
 0x1e2   :  { %1391 = vmatmul.f32.gmra.mxu2 %v2800_v55 }
 0x1e3   :  { %v1005_v21 = vpop.f32.mrf.mxu0  ;;  %v1070_v14 = vpop.f32.mrf.mxu1 }
 0x1e4   :  { %v1194_v41 = vpop.f32.mrf.mxu3  ;;  %v1006_v18 = vadd.f32 %v1005_v21, %v2479_v57  ;;  %v2813_v21 = vmax.f32 %v2269_v7, 0.0 }
 0x1e5   :  { %v1195_v32 = vadd.f32 %v1194_v41, %v1130_v28  ;;  %v1132_v20 = vpop.f32.mrf.mxu2 }
 0x1e6   :  { %1264 = vmatmul.f32.gmra.mxu0 %v2801_v33  ;;  %1329 = vmatmul.f32.gmra.mxu1 %v2802_v27  ;;  %v1133_v37 = vadd.f32 %v1132_v20, %v1068_v30  ;;  %v1071_v49 = vadd.f32 %v1070_v14, %v1006_v18  ;;  %v2815_v14 = vmax.f32 %v2287_v60, 0.0  ;;  %v2817_v30 = vmax.f32 %v2296_v23, 0.0 }
 0x1e7   :  { %1498 = vst [vmem:[#allocation10 + $0x40] sm:$0xff] %v1195_v32 }
 0x1e9   :  { %1456 = vmatmul.f32.gmra.mxu3 %v2803_v51  ;;  %v2819_v51 = vmax.f32 %v2315_v50, 0.0 }
 0x1ea   :  { %1394 = vmatmul.f32.gmra.mxu2 %v2804_v11 }
 0x1eb   :  { %v1008_v45 = vpop.f32.mrf.mxu0  ;;  %v1073_v29 = vpop.f32.mrf.mxu1 }
 0x1ec   :  { %v1197_v15 = vpop.f32.mrf.mxu3  ;;  %v1009_v58 = vadd.f32 %v1008_v45, %v2479_v57 }
 0x1ed   :  { %v1198_v1 = vadd.f32 %v1197_v15, %v1133_v37  ;;  %v1135_v43 = vpop.f32.mrf.mxu2 }
 0x1ee   :  { %1267 = vmatmul.f32.gmra.mxu0 %v2805_v9  ;;  %1332 = vmatmul.f32.gmra.mxu1 %v2806_v35  ;;  %v1136_v22 = vadd.f32 %v1135_v43, %v1071_v49  ;;  %v1074_v42 = vadd.f32 %v1073_v29, %v1009_v58  ;;  %v2823_v43 = vmax.f32 %v2343_v12, 0.0  ;;  %v2825_v9 = vmax.f32 %v2824_v10, 0.0  ;;  %v2829_v58 = vld [vmem:[#allocation30_spill] sm:$0xff] }
 0x1ef   :  { %1500 = vst [vmem:[#allocation10 + $0x50] sm:$0xff] %v1198_v1  ;;  %v2821_v1 = vmax.f32 %v2325_v52, 0.0 }
 0x1f1   :  { %1459 = vmatmul.f32.gmra.mxu3 %v2807_v16 }
 0x1f2   :  { %1397 = vmatmul.f32.gmra.mxu2 %v2808_v2 }
 0x1f3   :  { %v1011_v19 = vpop.f32.mrf.mxu0  ;;  %v1076_v46 = vpop.f32.mrf.mxu1 }
 0x1f4   :  { %v1200_v3 = vpop.f32.mrf.mxu3  ;;  %v1012_v55 = vadd.f32 %v1011_v19, %v2479_v57 }
 0x1f5   :  { %v1201_v17 = vadd.f32 %v1200_v3, %v1136_v22  ;;  %v1138_v4 = vpop.f32.mrf.mxu2  ;;  %v2828_v3 = vmax.f32 %v2371_v47, 0.0 }
 0x1f6   :  { %1270 = vmatmul.f32.gmra.mxu0 %v2809_v5  ;;  %1335 = vmatmul.f32.gmra.mxu1 %v2810_v13  ;;  %v1139_v36 = vadd.f32 %v1138_v4, %v1074_v42  ;;  %v1077_v39 = vadd.f32 %v1076_v46, %v1012_v55  ;;  %v2826_v46 = vmax.f32 %v2352_v54, 0.0 }
 0x1f7   :  { %1502 = vst [vmem:[#allocation10 + $0x60] sm:$0xff] %v1201_v17  ;;  %v2830_v17 = vmax.f32 %v2829_v58, 0.0 }
 0x1f9   :  { %1462 = vmatmul.f32.gmra.mxu3 %v2811_v25 }
 0x1fa   :  { %1400 = vmatmul.f32.gmra.mxu2 %v2812_v24 }
 0x1fb   :  { %v1014_v34 = vpop.f32.mrf.mxu0  ;;  %v1079_v44 = vpop.f32.mrf.mxu1 }
 0x1fc   :  { %v1203_v53 = vpop.f32.mrf.mxu3  ;;  %v1015_v33 = vadd.f32 %v1014_v34, %v2479_v57  ;;  %v2833_v34 = vld [vmem:[#allocation17_spill] sm:$0xff] }
 0x1fd   :  { %v1204_v28 = vadd.f32 %v1203_v53, %v1139_v36  ;;  %v1141_v48 = vpop.f32.mrf.mxu2  ;;  %v2831_v36 = vmax.f32 %v2381_v40, 0.0  ;;  %v2835_v53 = vld [vmem:[#allocation31_spill] sm:$0xff] }
 0x1fe   :  { %1273 = vmatmul.f32.gmra.mxu0 %v2813_v21  ;;  %1338 = vmatmul.f32.gmra.mxu1 %v2814_v38  ;;  %v1142_v41 = vadd.f32 %v1141_v48, %v1077_v39  ;;  %v1080_v60 = vadd.f32 %v1079_v44, %v1015_v33  ;;  %v2834_v44 = vmax.f32 %v2833_v34, 0.0  ;;  %v2836_v55 = vmax.f32 %v2835_v53, 0.0 }
 0x1ff   :  { %1504 = vst [vmem:[#allocation10 + $0x70] sm:$0xff] %v1204_v28 }
 0x201   :  { %1465 = vmatmul.f32.gmra.mxu3 %v2815_v14 }
 0x202   :  { %1403 = vmatmul.f32.gmra.mxu2 %v2816_v31  ;;  %v2837_v31 = vmax.f32 %v2408_v0, 0.0 }
 0x203   :  { %v1017_v62 = vpop.f32.mrf.mxu0  ;;  %v1082_v32 = vpop.f32.mrf.mxu1 }
 0x204   :  { %v1206_v20 = vpop.f32.mrf.mxu3  ;;  %v1018_v15 = vadd.f32 %v1017_v62, %v2479_v57  ;;  %v2839_v62 = vld [vmem:[#allocation16_spill] sm:$0xff] }
 0x205   :  { %v1207_v27 = vadd.f32 %v1206_v20, %v1142_v41  ;;  %v1144_v7 = vpop.f32.mrf.mxu2  ;;  %v2841_v20 = vld [vmem:[#allocation20_spill] sm:$0xff] }
 0x206   :  { %1276 = vmatmul.f32.gmra.mxu0 %v2817_v30  ;;  %1341 = vmatmul.f32.gmra.mxu1 %v2818_v56  ;;  %v1145_v11 = vadd.f32 %v1144_v7, %v1080_v60  ;;  %v1083_v50 = vadd.f32 %v1082_v32, %v1018_v15  ;;  %v2840_v32 = vmax.f32 %v2839_v62, 0.0  ;;  %v2842_v33 = vmax.f32 %v2841_v20, 0.0 }
 0x207   :  { %1506 = vst [vmem:[#allocation10 + $0x80] sm:$0xff] %v1207_v27 }
 0x209   :  { %1468 = vmatmul.f32.gmra.mxu3 %v2819_v51 }
 0x20a   :  { %1406 = vmatmul.f32.gmra.mxu2 %v2820_v61  ;;  %v2843_v61 = vld [vmem:[#allocation18_spill] sm:$0xff] }
 0x20b   :  { %v1020_v37 = vpop.f32.mrf.mxu0  ;;  %v1085_v45 = vpop.f32.mrf.mxu1 }
 0x20c   :  { %v1209_v29 = vpop.f32.mrf.mxu3  ;;  %v1021_v22 = vadd.f32 %v1020_v37, %v2479_v57  ;;  %v2846_v37 = vmax.f32 %v2845_v26, 0.0 }
 0x20d   :  { %v1210_v18 = vadd.f32 %v1209_v29, %v1145_v11  ;;  %v1147_v23 = vpop.f32.mrf.mxu2  ;;  %v2844_v11 = vmax.f32 %v2843_v61, 0.0  ;;  %v2847_v29 = vld [vmem:[#allocation22_spill] sm:$0xff] }
 0x20e   :  { %1279 = vmatmul.f32.gmra.mxu0 %v2821_v1  ;;  %1344 = vmatmul.f32.gmra.mxu1 %v2822_v63  ;;  %v1148_v35 = vadd.f32 %v1147_v23, %v1083_v50  ;;  %v1086_v12 = vadd.f32 %v1085_v45, %v1021_v22  ;;  %v2848_v15 = vmax.f32 %v2847_v29, 0.0  ;;  %v2852_v22 = vld [vmem:[#allocation33_spill] sm:$0xff] }
 0x20f   :  { %1508 = vst [vmem:[#allocation10 + $0x90] sm:$0xff] %v1210_v18  ;;  %v2849_v18 = vld [vmem:[#allocation32_spill] sm:$0xff] }
 0x210   :  { %v2850_v23 = vmax.f32 %v2849_v18, 0.0 }
 0x211   :  { %1471 = vmatmul.f32.gmra.mxu3 %v2823_v43 }
 0x212   :  { %1409 = vmatmul.f32.gmra.mxu2 %v2825_v9 }
 0x213   :  { %v1023_v49 = vpop.f32.mrf.mxu0  ;;  %v1088_v16 = vpop.f32.mrf.mxu1 }
 0x214   :  { %v1212_v2 = vpop.f32.mrf.mxu3  ;;  %v1024_v25 = vadd.f32 %v1023_v49, %v2479_v57 }
 0x215   :  { %v1213_v19 = vadd.f32 %v1212_v2, %v1148_v35  ;;  %v1150_v52 = vpop.f32.mrf.mxu2 }
 0x216   :  { %1282 = vmatmul.f32.gmra.mxu0 %v2826_v46  ;;  %1347 = vmatmul.f32.gmra.mxu1 %v2827_v59  ;;  %v1151_v4 = vadd.f32 %v1150_v52, %v1086_v12  ;;  %v1089_v47 = vadd.f32 %v1088_v16, %v1024_v25  ;;  %v2851_v16 = vld [vmem:[#allocation34_spill] sm:$0xff] }
 0x217   :  { %1510 = vst [vmem:[#allocation10 + $0xa0] sm:$0xff] %v1213_v19  ;;  %v2622_v2 = vperm.slane %v2851_v16, 1  ;;  %v2853_v19 = vmax.f32 %v2852_v22, 0.0 }
 0x219   :  { %1474 = vmatmul.f32.gmra.mxu3 %v2828_v3 }
 0x21a   :  { %1412 = vmatmul.f32.gmra.mxu2 %v2830_v17 }
 0x21b   :  { %v1026_v5 = vpop.f32.mrf.mxu0  ;;  %v1091_v13 = vpop.f32.mrf.mxu1 }
 0x21c   :  { %v1215_v42 = vpop.f32.mrf.mxu3  ;;  %v1027_v39 = vadd.f32 %v1026_v5, %v2479_v57 }
 0x21d   :  { %v1216_v24 = vadd.f32 %v1215_v42, %v1151_v4  ;;  %v1153_v54 = vpop.f32.mrf.mxu2 }
 0x21e   :  { %1285 = vmatmul.f32.gmra.mxu0 %v2831_v36  ;;  %1350 = vmatmul.f32.gmra.mxu1 %v2832_v8  ;;  %v1154_v28 = vadd.f32 %v1153_v54, %v1089_v47  ;;  %v1092_v41 = vadd.f32 %v1091_v13, %v1027_v39 }
 0x21f   :  { %1512 = vst [vmem:[#allocation10 + $0xb0] sm:$0xff] %v1216_v24 }
 0x221   :  { %1477 = vmatmul.f32.gmra.mxu3 %v2834_v44 }
 0x222   :  { %1415 = vmatmul.f32.gmra.mxu2 %v2836_v55 }
 0x223   :  { %v1029_v48 = vpop.f32.mrf.mxu0  ;;  %v1094_v21 = vpop.f32.mrf.mxu1 }
 0x224   :  { %v1218_v38 = vpop.f32.mrf.mxu3  ;;  %v1030_v60 = vadd.f32 %v1029_v48, %v2479_v57 }
 0x225   :  { %v1219_v14 = vadd.f32 %v1218_v38, %v1154_v28  ;;  %v1156_v40 = vpop.f32.mrf.mxu2 }
 0x226   :  { %1288 = vmatmul.f32.gmra.mxu0 %v2837_v31  ;;  %1353 = vmatmul.f32.gmra.mxu1 %v2838_v6  ;;  %v1157_v27 = vadd.f32 %v1156_v40, %v1092_v41  ;;  %v1095_v45 = vadd.f32 %v1094_v21, %v1030_v60 }
 0x227   :  { %1514 = vst [vmem:[#allocation10 + $0xc0] sm:$0xff] %v1219_v14 }
 0x229   :  { %1480 = vmatmul.f32.gmra.mxu3 %v2840_v32 }
 0x22a   :  { %1418 = vmatmul.f32.gmra.mxu2 %v2842_v33 }
 0x22b   :  { %v1032_v7 = vpop.f32.mrf.mxu0  ;;  %v1097_v30 = vpop.f32.mrf.mxu1 }
 0x22c   :  { %v1221_v56 = vpop.f32.mrf.mxu3  ;;  %v1033_v10 = vadd.f32 %v1032_v7, %v2479_v57 }
 0x22d   :  { %v1222_v51 = vadd.f32 %v1221_v56, %v1157_v27  ;;  %v1159_v0 = vpop.f32.mrf.mxu2 }
 0x22e   :  { %1291 = vmatmul.f32.gmra.mxu0 %v2844_v11  ;;  %1356 = vmatmul.f32.gmra.mxu1 %v2846_v37  ;;  %v1160_v1 = vadd.f32 %v1159_v0, %v1095_v45  ;;  %v1098_v49 = vadd.f32 %v1097_v30, %v1033_v10 }
 0x22f   :  { %1516 = vst [vmem:[#allocation10 + $0xd0] sm:$0xff] %v1222_v51 }
 0x231   :  { %1483 = vmatmul.f32.gmra.mxu3 %v2848_v15 }
 0x232   :  { %1421 = vmatmul.f32.gmra.mxu2 %v2850_v23 }
 0x233   :  { %v1247_v63 = vpop.f32.mrf.mxu0  ;;  %v1312_v50 = vpop.f32.mrf.mxu1 }
 0x234   :  { %v1224_v43 = vpop.f32.mrf.mxu3  ;;  %v1248_v3 = vadd.f32 %v1247_v63, %v2622_v2 }
 0x235   :  { %v1225_v9 = vadd.f32 %v1224_v43, %v1160_v1  ;;  %v1162_v35 = vpop.f32.mrf.mxu2 }
 0x236   :  { %v1163_v52 = vadd.f32 %v1162_v35, %v1098_v49  ;;  %v1313_v57 = vadd.f32 %v1312_v50, %v1248_v3 }
 0x237   :  { %1518 = vst [vmem:[#allocation10 + $0xe0] sm:$0xff] %v1225_v9 }
 0x239   :  { %1486 = vmatmul.f32.gmra.mxu3 %v2853_v19 }
 0x23b   :  { %v1250_v46 = vpop.f32.mrf.mxu0  ;;  %v1315_v59 = vpop.f32.mrf.mxu1 }
 0x23c   :  { %v1227_v12 = vpop.f32.mrf.mxu3  ;;  %v1251_v25 = vadd.f32 %v1250_v46, %v2622_v2 }
 0x23d   :  { %v1228_v58 = vadd.f32 %v1227_v12, %v1163_v52  ;;  %v1377_v17 = vpop.f32.mrf.mxu2 }
 0x23e   :  { %v1378_v4 = vadd.f32 %v1377_v17, %v1313_v57  ;;  %v1316_v36 = vadd.f32 %v1315_v59, %v1251_v25 }
 0x23f   :  { %1520 = vst [vmem:[#allocation10 + $0xf0] sm:$0xff] %v1228_v58 }
 0x243   :  { %v1253_v5 = vpop.f32.mrf.mxu0  ;;  %v1318_v13 = vpop.f32.mrf.mxu1 }
 0x244   :  { %v1442_v42 = vpop.f32.mrf.mxu3  ;;  %v1254_v53 = vadd.f32 %v1253_v5, %v2622_v2 }
 0x245   :  { %v1443_v24 = vadd.f32 %v1442_v42, %v1378_v4  ;;  %v1380_v54 = vpop.f32.mrf.mxu2 }
 0x246   :  { %v1381_v8 = vadd.f32 %v1380_v54, %v1316_v36  ;;  %v1319_v48 = vadd.f32 %v1318_v13, %v1254_v53 }
 0x247   :  { %1491 = vst [vmem:[#allocation10 + $0x8] sm:$0xff] %v1443_v24 }
 0x24b   :  { %v1256_v47 = vpop.f32.mrf.mxu0  ;;  %v1321_v34 = vpop.f32.mrf.mxu1 }
 0x24c   :  { %v1445_v44 = vpop.f32.mrf.mxu3  ;;  %v1257_v40 = vadd.f32 %v1256_v47, %v2622_v2 }
 0x24d   :  { %v1446_v55 = vadd.f32 %v1445_v44, %v1381_v8  ;;  %v1383_v28 = vpop.f32.mrf.mxu2 }
 0x24e   :  { %v1384_v21 = vadd.f32 %v1383_v28, %v1319_v48  ;;  %v1322_v41 = vadd.f32 %v1321_v34, %v1257_v40 }
 0x24f   :  { %1493 = vst [vmem:[#allocation10 + $0x18] sm:$0xff] %v1446_v55 }
 0x253   :  { %v1259_v38 = vpop.f32.mrf.mxu0  ;;  %v1324_v39 = vpop.f32.mrf.mxu1 }
 0x254   :  { %v1448_v14 = vpop.f32.mrf.mxu3  ;;  %v1260_v27 = vadd.f32 %v1259_v38, %v2622_v2 }
 0x255   :  { %v1449_v31 = vadd.f32 %v1448_v14, %v1384_v21  ;;  %v1386_v6 = vpop.f32.mrf.mxu2 }
 0x256   :  { %v1387_v62 = vadd.f32 %v1386_v6, %v1322_v41  ;;  %v1325_v56 = vadd.f32 %v1324_v39, %v1260_v27 }
 0x257   :  { %1495 = vst [vmem:[#allocation10 + $0x28] sm:$0xff] %v1449_v31 }
 0x25b   :  { %v1262_v32 = vpop.f32.mrf.mxu0  ;;  %v1327_v20 = vpop.f32.mrf.mxu1 }
 0x25c   :  { %v1451_v33 = vpop.f32.mrf.mxu3  ;;  %v1263_v11 = vadd.f32 %v1262_v32, %v2622_v2 }
 0x25d   :  { %v1452_v7 = vadd.f32 %v1451_v33, %v1387_v62  ;;  %v1389_v30 = vpop.f32.mrf.mxu2 }
 0x25e   :  { %v1390_v60 = vadd.f32 %v1389_v30, %v1325_v56  ;;  %v1328_v45 = vadd.f32 %v1327_v20, %v1263_v11 }
 0x25f   :  { %1497 = vst [vmem:[#allocation10 + $0x38] sm:$0xff] %v1452_v7 }
 0x263   :  { %v1265_v51 = vpop.f32.mrf.mxu0  ;;  %v1330_v0 = vpop.f32.mrf.mxu1 }
 0x264   :  { %v1454_v61 = vpop.f32.mrf.mxu3  ;;  %v1266_v1 = vadd.f32 %v1265_v51, %v2622_v2 }
 0x265   :  { %v1455_v26 = vadd.f32 %v1454_v61, %v1390_v60  ;;  %v1392_v37 = vpop.f32.mrf.mxu2 }
 0x266   :  { %v1393_v29 = vadd.f32 %v1392_v37, %v1328_v45  ;;  %v1331_v43 = vadd.f32 %v1330_v0, %v1266_v1 }
 0x267   :  { %1499 = vst [vmem:[#allocation10 + $0x48] sm:$0xff] %v1455_v26 }
 0x26b   :  { %v1268_v15 = vpop.f32.mrf.mxu0  ;;  %v1333_v18 = vpop.f32.mrf.mxu1 }
 0x26c   :  { %v1457_v23 = vpop.f32.mrf.mxu3  ;;  %v1269_v16 = vadd.f32 %v1268_v15, %v2622_v2 }
 0x26d   :  { %v1458_v63 = vadd.f32 %v1457_v23, %v1393_v29  ;;  %v1395_v50 = vpop.f32.mrf.mxu2 }
 0x26e   :  { %v1396_v10 = vadd.f32 %v1395_v50, %v1331_v43  ;;  %v1334_v52 = vadd.f32 %v1333_v18, %v1269_v16 }
 0x26f   :  { %1501 = vst [vmem:[#allocation10 + $0x58] sm:$0xff] %v1458_v63 }
 0x273   :  { %v1271_v9 = vpop.f32.mrf.mxu0  ;;  %v1336_v35 = vpop.f32.mrf.mxu1 }
 0x274   :  { %v1460_v49 = vpop.f32.mrf.mxu3  ;;  %v1272_v58 = vadd.f32 %v1271_v9, %v2622_v2 }
 0x275   :  { %v1461_v22 = vadd.f32 %v1460_v49, %v1396_v10  ;;  %v1398_v19 = vpop.f32.mrf.mxu2 }
 0x276   :  { %v1399_v46 = vadd.f32 %v1398_v19, %v1334_v52  ;;  %v1337_v4 = vadd.f32 %v1336_v35, %v1272_v58 }
 0x277   :  { %1503 = vst [vmem:[#allocation10 + $0x68] sm:$0xff] %v1461_v22 }
 0x27b   :  { %v1274_v59 = vpop.f32.mrf.mxu0  ;;  %v1339_v12 = vpop.f32.mrf.mxu1 }
 0x27c   :  { %v1463_v3 = vpop.f32.mrf.mxu3  ;;  %v1275_v25 = vadd.f32 %v1274_v59, %v2622_v2 }
 0x27d   :  { %v1464_v17 = vadd.f32 %v1463_v3, %v1399_v46  ;;  %v1401_v57 = vpop.f32.mrf.mxu2 }
 0x27e   :  { %v1402_v5 = vadd.f32 %v1401_v57, %v1337_v4  ;;  %v1340_v8 = vadd.f32 %v1339_v12, %v1275_v25 }
 0x27f   :  { %1505 = vst [vmem:[#allocation10 + $0x78] sm:$0xff] %v1464_v17 }
 0x283   :  { %v1277_v13 = vpop.f32.mrf.mxu0  ;;  %v1342_v36 = vpop.f32.mrf.mxu1 }
 0x284   :  { %v1466_v42 = vpop.f32.mrf.mxu3  ;;  %v1278_v53 = vadd.f32 %v1277_v13, %v2622_v2 }
 0x285   :  { %v1467_v24 = vadd.f32 %v1466_v42, %v1402_v5  ;;  %v1404_v54 = vpop.f32.mrf.mxu2 }
 0x286   :  { %v1405_v47 = vadd.f32 %v1404_v54, %v1340_v8  ;;  %v1343_v21 = vadd.f32 %v1342_v36, %v1278_v53 }
 0x287   :  { %1507 = vst [vmem:[#allocation10 + $0x88] sm:$0xff] %v1467_v24 }
 0x28b   :  { %v1280_v34 = vpop.f32.mrf.mxu0  ;;  %v1345_v48 = vpop.f32.mrf.mxu1 }
 0x28c   :  { %v1469_v44 = vpop.f32.mrf.mxu3  ;;  %v1281_v40 = vadd.f32 %v1280_v34, %v2622_v2 }
 0x28d   :  { %v1470_v55 = vadd.f32 %v1469_v44, %v1405_v47  ;;  %v1407_v28 = vpop.f32.mrf.mxu2 }
 0x28e   :  { %v1408_v38 = vadd.f32 %v1407_v28, %v1343_v21  ;;  %v1346_v41 = vadd.f32 %v1345_v48, %v1281_v40 }
 0x28f   :  { %1509 = vst [vmem:[#allocation10 + $0x98] sm:$0xff] %v1470_v55 }
 0x293   :  { %v1283_v39 = vpop.f32.mrf.mxu0  ;;  %v1348_v62 = vpop.f32.mrf.mxu1 }
 0x294   :  { %v1472_v14 = vpop.f32.mrf.mxu3  ;;  %v1284_v33 = vadd.f32 %v1283_v39, %v2622_v2 }
 0x295   :  { %v1473_v31 = vadd.f32 %v1472_v14, %v1408_v38  ;;  %v1410_v6 = vpop.f32.mrf.mxu2 }
 0x296   :  { %v1411_v32 = vadd.f32 %v1410_v6, %v1346_v41  ;;  %v1349_v56 = vadd.f32 %v1348_v62, %v1284_v33 }
 0x297   :  { %1511 = vst [vmem:[#allocation10 + $0xa8] sm:$0xff] %v1473_v31 }
 0x29b   :  { %v1286_v30 = vpop.f32.mrf.mxu0  ;;  %v1351_v51 = vpop.f32.mrf.mxu1 }
 0x29c   :  { %v1475_v20 = vpop.f32.mrf.mxu3  ;;  %v1287_v61 = vadd.f32 %v1286_v30, %v2622_v2 }
 0x29d   :  { %v1476_v27 = vadd.f32 %v1475_v20, %v1411_v32  ;;  %v1413_v7 = vpop.f32.mrf.mxu2 }
 0x29e   :  { %v1414_v60 = vadd.f32 %v1413_v7, %v1349_v56  ;;  %v1352_v45 = vadd.f32 %v1351_v51, %v1287_v61 }
 0x29f   :  { %1513 = vst [vmem:[#allocation10 + $0xb8] sm:$0xff] %v1476_v27 }
 0x2a3   :  { %v1289_v37 = vpop.f32.mrf.mxu0  ;;  %v1354_v1 = vpop.f32.mrf.mxu1 }
 0x2a4   :  { %v1478_v0 = vpop.f32.mrf.mxu3  ;;  %v1290_v18 = vadd.f32 %v1289_v37, %v2622_v2 }
 0x2a5   :  { %v1479_v11 = vadd.f32 %v1478_v0, %v1414_v60  ;;  %v1416_v26 = vpop.f32.mrf.mxu2 }
 0x2a6   :  { %v1417_v29 = vadd.f32 %v1416_v26, %v1352_v45  ;;  %v1355_v50 = vadd.f32 %v1354_v1, %v1290_v18 }
 0x2a7   :  { %1515 = vst [vmem:[#allocation10 + $0xc8] sm:$0xff] %v1479_v11 }
 0x2ab   :  { %v1292_v43 = vpop.f32.mrf.mxu0  ;;  %v1357_v16 = vpop.f32.mrf.mxu1 }
 0x2ac   :  { %v1481_v15 = vpop.f32.mrf.mxu3  ;;  %v1293_v35 = vadd.f32 %v1292_v43, %v2622_v2 }
 0x2ad   :  { %v1482_v23 = vadd.f32 %v1481_v15, %v1417_v29  ;;  %v1419_v63 = vpop.f32.mrf.mxu2 }
 0x2ae   :  { %v1420_v10 = vadd.f32 %v1419_v63, %v1355_v50  ;;  %v1358_v19 = vadd.f32 %v1357_v16, %v1293_v35 }
 0x2af   :  { %1517 = vst [vmem:[#allocation10 + $0xd8] sm:$0xff] %v1482_v23 }
 0x2b4   :  { %v1484_v9 = vpop.f32.mrf.mxu3 }
 0x2b5   :  { %v1485_v49 = vadd.f32 %v1484_v9, %v1420_v10  ;;  %v1422_v22 = vpop.f32.mrf.mxu2 }
 0x2b6   :  { %v1423_v52 = vadd.f32 %v1422_v22, %v1358_v19 }
 0x2b7   :  { %1519 = vst [vmem:[#allocation10 + $0xe8] sm:$0xff] %v1485_v49 }
 0x2bc   :  { %v1487_v46 = vpop.f32.mrf.mxu3 }
 0x2bd   :  { %v1488_v59 = vadd.f32 %v1487_v46, %v1423_v52 }
 0x2bf   :  { %1521 = vst [vmem:[#allocation10 + $0xf8] sm:$0xff] %v1488_v59 }
 0x2c0   :  { %1525 = vsyncadd [#allocation4], 3584  ;;  %s1528_s16 = sshll.u32 %s2653_s5, 4  ;;  %s1688_s17 = smov [#allocation10]   ;;  %s1529_s16 = int_to_ptr.hbm [resolvable:$true] %s1528_s16 }
 0x2c1   :  { %s1526_s18 = sshll.u32 %s1688_s17, 4  ;;  %s1527_s18 = int_to_ptr.vmem [resolvable:$true] %s1526_s18 }
 0x2c2   :  { %1534 = dma.vmem_to_hbm [thread:$0]  %s1527_s18, 512, %s1529_s16, [#allocation4], %s1684_s30, %s1684_s30, %s1685_s6  }
 0x2c3   :  { %1678 = dma.done.wait [#allocation4], 4096  }
 0x2c4   :  { %1679 = vsyncadd [#allocation4], 4294963200 }
 0x2c5   :  { %1539 = vsyncpa [#allocation3], 1 }
 0x2c6   :  { %1540 = vsyncpa [#allocation6], 1 }
 0x2c7   :  { %1541 = vsyncpa [#allocation9], 1 }
 0x2c8   :  { %1542 = vsyncpa [#allocation4], 1 }

</bundles_post_ra>
